<compile_context>
chip_gen: v7x
topology: tpu7x:2x2x1
jax: 0.10.0
libtpu: 0.0.40
codegen_flags: <defaults>
</compile_context>

<pallas_src>
import functools

import jax
import jax.numpy as jnp
from jax import lax
from jax.experimental import pallas as pl
from jax.experimental.pallas import tpu as pltpu

EPS = 1e-5


# ---------------------------------------------------------------------------
# helpers
# ---------------------------------------------------------------------------

def _vmem_cap_bytes():
    """~90% of per-core physical VMEM; conservative (v7x-sized) fallback."""
    try:
        cap = int(pltpu.get_tpu_info().vmem_capacity_bytes)
        if cap > 0:
            return int(0.9 * cap)
    except Exception:
        pass
    return int(0.9 * (64 << 20))   # safe on every generation


def _largest_divisor_tile(n, target, align):
    """Largest divisor of n <= target, preferring multiples of `align`.

    Never falls back to the untiled extent when n > target, so a huge
    contraction dim can never request one enormous block.
    """
    if n <= target:
        return n
    best_any = 1
    for d in range(target, 0, -1):
        if n % d == 0:
            if best_any == 1:
                best_any = d
            if d % align == 0:
                return d
    return best_any


# ---------------------------------------------------------------------------
# kernel 1: backbone (flatten + Linear), M x K tiled
# ---------------------------------------------------------------------------

def backbone_kernel(x_ref, wb_ref, bb_ref, f_ref):
    k = pl.program_id(1)

    @pl.when(k == 0)
    def _():
        f_ref[...] = jnp.zeros_like(f_ref)

    # bf16 MXU operands (x tile cast in-kernel from f32), f32 accumulation
    # directly into the resident output block.
    f_ref[...] += jnp.dot(x_ref[...].astype(jnp.bfloat16), wb_ref[...],
                          preferred_element_type=jnp.float32)

    @pl.when(k == pl.num_programs(1) - 1)
    def _():
        f_ref[...] += bb_ref[...]


# ---------------------------------------------------------------------------
# kernel 2: projector + predictor head (one view per grid step)
# ---------------------------------------------------------------------------

def _bn_train(h, gamma=None, beta=None):
    """BatchNorm1d, training mode: batch stats, biased variance, eps=1e-5.

    Two-pass variance (mean first, then E[(x-mean)^2]) for numerical safety.
    """
    mean = jnp.mean(h, axis=0, keepdims=True)
    var = jnp.mean(jnp.square(h - mean), axis=0, keepdims=True)
    out = (h - mean) * lax.rsqrt(var + EPS)
    if gamma is not None:
        out = out * gamma + beta
    return out


def head_kernel(f_ref,
                w1_ref, g1_ref, be1_ref,
                w2_ref, g2_ref, be2_ref,
                w3_ref,
                wp1_ref, gp1_ref, bep1_ref,
                wp2_ref, bp2_ref,
                z_ref, p_ref):
    bf16 = jnp.bfloat16
    f = f_ref[0]                                               # [N, d_feat] f32

    # ---- projector ----
    h1 = jnp.dot(f.astype(bf16), w1_ref[...], preferred_element_type=jnp.float32)
    h1 = jnp.maximum(_bn_train(h1, g1_ref[...], be1_ref[...]), 0.0)

    h2 = jnp.dot(h1.astype(bf16), w2_ref[...], preferred_element_type=jnp.float32)
    h2 = jnp.maximum(_bn_train(h2, g2_ref[...], be2_ref[...]), 0.0)

    # Final projector Linear bias omitted: the affine-free BatchNorm below
    # subtracts the per-feature batch mean, cancelling any constant bias.
    z = _bn_train(jnp.dot(h2.astype(bf16), w3_ref[...],
                          preferred_element_type=jnp.float32))
    z_ref[0] = z

    # ---- predictor ----
    q1 = jnp.dot(z.astype(bf16), wp1_ref[...], preferred_element_type=jnp.float32)
    q1 = jnp.maximum(_bn_train(q1, gp1_ref[...], bep1_ref[...]), 0.0)

    p_ref[0] = jnp.dot(q1.astype(bf16), wp2_ref[...],
                       preferred_element_type=jnp.float32) + bp2_ref[...]


# ---------------------------------------------------------------------------
# wrapper
# ---------------------------------------------------------------------------

def simsiam_forward(x, params, *, tk_target=None, tm_target=256):
    """x: [N, 2, C, H, W] float32.  Returns {'f': [f1,f2], 'z': [z1,z2], 'p': [p1,p2]}."""
    N, V, C, H, W = x.shape
    assert V == 2, "SimSiam expects two views stacked on dim=1"
    d_in = C * H * W
    M = V * N                                   # both views stacked into matmul M

    bf16, f32 = jnp.bfloat16, jnp.float32
    d_feat = params["wb"].shape[1]
    d_hidden = params["w1"].shape[1]
    d_out = params["w3"].shape[1]
    d_ph = params["wp1"].shape[1]

    cap = _vmem_cap_bytes()
    if tk_target is None:
        # Bigger K tiles where VMEM allows (v5e/v6e: 128 MiB, v7x: 64 MiB).
        tk_target = 1024 if cap > (80 << 20) else 512

    # [N, 2, C, H, W] -> [2N, d_in]: views interleaved by row.  Pure reshape —
    # no transpose, no extra HBM pass, no separate bf16 copy of x.
    xf = x.reshape(M, d_in)

    tk = _largest_divisor_tile(d_in, tk_target, 128)
    tm = _largest_divisor_tile(M, tm_target, 8)
    nk = d_in // tk
    nm = M // tm

    wb = params["wb"].astype(bf16)              # in practice stored as bf16
    bb = params["bb"].astype(f32)

    est_backbone = (2 * (tm * tk * 4 + tk * d_feat * 2)    # x / wb tiles, 2 buffers
                    + 2 * tm * d_feat * 4                   # resident f output block
                    + 2 * d_feat * 4)                       # bias
    vmem_backbone = min(cap, max(32 << 20, int(1.5 * est_backbone)))

    f_il = pl.pallas_call(
        backbone_kernel,
        out_shape=jax.ShapeDtypeStruct((M, d_feat), f32),
        grid=(nm, nk),
        in_specs=[
            pl.BlockSpec((tm, tk), lambda i, k: (i, k)),
            pl.BlockSpec((tk, d_feat), lambda i, k: (k, 0)),
            pl.BlockSpec((1, d_feat), lambda i, k: (0, 0)),
        ],
        out_specs=pl.BlockSpec((tm, d_feat), lambda i, k: (i, 0)),
        compiler_params=pltpu.CompilerParams(
            dimension_semantics=("parallel", "arbitrary"),
            vmem_limit_bytes=vmem_backbone,
        ),
    )(xf, wb, bb)

    # De-interleave only the small feature slab: [2N, d_feat] -> [2, N, d_feat]
    # (per-view contiguous) so each head grid step sees a full view for BN.
    f_views = f_il.reshape(N, 2, d_feat).transpose(1, 0, 2)

    head_weights = [
        params["w1"].astype(bf16), params["g1"].astype(f32), params["be1"].astype(f32),
        params["w2"].astype(bf16), params["g2"].astype(f32), params["be2"].astype(f32),
        params["w3"].astype(bf16),
        params["wp1"].astype(bf16), params["gp1"].astype(f32), params["bep1"].astype(f32),
        params["wp2"].astype(bf16), params["bp2"].astype(f32),
    ]

    def _const_spec(a):
        return pl.BlockSpec(a.shape, lambda v: (0,) * a.ndim)

    w_bytes = sum(int(a.size) * a.dtype.itemsize for a in head_weights)
    blk_bytes = (N * d_feat + 2 * N * d_out) * 4
    act_bytes = 10 * N * max(d_feat, d_hidden, d_out, d_ph) * 4
    vmem_head = min(cap, max(32 << 20,
                             int(1.5 * (2 * (w_bytes + blk_bytes) + act_bytes))))

    z, p = pl.pallas_call(
        head_kernel,
        out_shape=(jax.ShapeDtypeStruct((2, N, d_out), f32),
                   jax.ShapeDtypeStruct((2, N, d_out), f32)),
        grid=(2,),
        in_specs=[pl.BlockSpec((1, N, d_feat), lambda v: (v, 0, 0))]
                 + [_const_spec(a) for a in head_weights],
        out_specs=(pl.BlockSpec((1, N, d_out), lambda v: (v, 0, 0)),
                   pl.BlockSpec((1, N, d_out), lambda v: (v, 0, 0))),
        compiler_params=pltpu.CompilerParams(
            dimension_semantics=("parallel",),
            vmem_limit_bytes=vmem_head,
        ),
    )(f_views, *head_weights)

    # TODO(synk): at reference scale (batch >= 256, 2048-wide layers) also tile
    # the head over the per-view batch with a two-pass BatchNorm moments scheme
    # (accumulate per-tile sum / sum-of-squares, normalize in a second pass) so
    # the activation slab stays tile-bounded on v7x's 64 MiB VMEM.

    return {
        "f": [f_views[0], f_views[1]],
        "z": [z[0], z[1]],
        "p": [p[0], p[1]],
    }


# ---------------------------------------------------------------------------
# params + pure-JAX reference
# ---------------------------------------------------------------------------

def init_params(key, d_in, d_feat, d_hidden, d_out, d_pred_hidden):
    """Deterministic parameter init.  Linear weights stored [in, out]."""
    ks = jax.random.split(key, 8)

    def lin(k, fan_in, fan_out):
        bound = 1.0 / jnp.sqrt(fan_in)
        return jax.random.uniform(k, (fan_in, fan_out), jnp.float32, -bound, bound)

    return {
        # backbone: flatten + Linear(d_in -> d_feat)
        "wb": lin(ks[0], d_in, d_feat),
        "bb": jax.random.uniform(ks[1], (1, d_feat), jnp.float32, -0.1, 0.1),
        # projector (final Linear bias omitted: cancelled by the affine-free BN)
        "w1": lin(ks[2], d_feat, d_hidden),
        "g1": jnp.ones((1, d_hidden), jnp.float32),
        "be1": jnp.zeros((1, d_hidden), jnp.float32),
        "w2": lin(ks[3], d_hidden, d_hidden),
        "g2": jnp.ones((1, d_hidden), jnp.float32),
        "be2": jnp.zeros((1, d_hidden), jnp.float32),
        "w3": lin(ks[4], d_hidden, d_out),
        # predictor
        "wp1": lin(ks[5], d_out, d_pred_hidden),
        "gp1": jnp.ones((1, d_pred_hidden), jnp.float32),
        "bep1": jnp.zeros((1, d_pred_hidden), jnp.float32),
        "wp2": lin(ks[6], d_pred_hidden, d_out),
        "bp2": jax.random.uniform(ks[7], (1, d_out), jnp.float32, -0.1, 0.1),
    }


def simsiam_reference(x, params):
    """Pure-JAX f32 reference mirroring the PyTorch forward (training-mode BN)."""
    N = x.shape[0]
    d_in = x.shape[2] * x.shape[3] * x.shape[4]

    def bn(h, gamma=None, beta=None):
        mean = jnp.mean(h, axis=0, keepdims=True)
        var = jnp.mean((h - mean) ** 2, axis=0, keepdims=True)
        out = (h - mean) / jnp.sqrt(var + EPS)
        if gamma is not None:
            out = out * gamma + beta
        return out

    def one_view(xi):
        xi = xi.reshape(N, d_in)
        f = xi @ params["wb"] + params["bb"]
        h = jnp.maximum(bn(f @ params["w1"], params["g1"], params["be1"]), 0.0)
        h = jnp.maximum(bn(h @ params["w2"], params["g2"], params["be2"]), 0.0)
        z = bn(h @ params["w3"])
        q = jnp.maximum(bn(z @ params["wp1"], params["gp1"], params["bep1"]), 0.0)
        p = q @ params["wp2"] + params["bp2"]
        return f, z, p

    f1, z1, p1 = one_view(x[:, 0])
    f2, z2, p2 = one_view(x[:, 1])
    return {"f": [f1, f2], "z": [z1, z2], "p": [p1, p2]}


# ---------------------------------------------------------------------------
# demo / self-test
# ---------------------------------------------------------------------------

if __name__ == "__main__":
    # Small, TPU-friendly shapes (hot dims are multiples of (8, 128)).
    B, C, H, W = 8, 4, 16, 16        # x: [B, 2, C, H, W], d_in = 1024
    projector_in_dim = 128           # backbone feature dim (module default)
    proj_hidden_dim = 256            # (reference default 2048, shrunk for demo)
    proj_output_dim = 256            # (reference default 2048, shrunk for demo)
    pred_hidden_dim = 128            # (reference default 512, shrunk for demo)

    key = jax.random.PRNGKey(0)
    kx, kp = jax.random.split(key)
    x = jax.random.normal(kx, (B, 2, C, H, W), jnp.float32)
    params = init_params(kp, C * H * W, projector_in_dim, proj_hidden_dim,
                         proj_output_dim, pred_hidden_dim)

    # Force tk=256 here so the K-tiled accumulation path is exercised on every
    # generation (default tile picking would make d_in=1024 a single tile).
    fwd = jax.jit(functools.partial(simsiam_forward, tk_target=256))
    out = fwd(x, params)
    jax.block_until_ready(out)

    # Shape checks.
    assert out["f"][0].shape == (B, projector_in_dim)
    assert out["z"][0].shape == (B, proj_output_dim)
    assert out["p"][1].shape == (B, proj_output_dim)

    # Numerical check against a pure-JAX f32 reference.  Kernel matmuls run in
    # bf16 with f32 accumulation, so the tolerance is bf16-level (values O(1)).
    ref = simsiam_reference(x, params)
    for name in ("f", "z", "p"):
        for v in range(2):
            err = float(jnp.max(jnp.abs(out[name][v] - ref[name][v])))
            assert err < 1e-1, (name, v, err)

    print("KERNEL_OK")
</pallas_src>

<mosaic_0001>
module attributes {stable_mosaic.version = 11 : i64} {
  func.func @backbone_kernel(%arg0: i32, %arg1: i32, %arg2: memref<16x256xf32, #tpu.memory_space<vmem>>, %arg3: memref<256x128xbf16, #tpu.memory_space<vmem>>, %arg4: memref<1x128xf32, #tpu.memory_space<vmem>>, %arg5: memref<16x128xf32, #tpu.memory_space<vmem>>) attributes {dimension_semantics = [#tpu.dimension_semantics<parallel>, #tpu.dimension_semantics<arbitrary>], iteration_bounds = array<i64: 1, 4>, scalar_prefetch = 0 : i64, scratch_operands = 0 : i64, tpu.core_type = #tpu.core_type<tc>, window_params = [{transform_indices = @transform_0, window_bounds = array<i64: 16, 256>}, {transform_indices = @transform_1, window_bounds = array<i64: 256, 128>}, {pipeline_mode = #tpu.pipeline_mode<synchronous>, transform_indices = @transform_2, window_bounds = array<i64: 1, 128>}, {transform_indices = @transform_3, window_bounds = array<i64: 16, 128>}]} {
    %c0_i32 = arith.constant 0 : i32
    %0 = arith.cmpi eq, %arg1, %c0_i32 : i32
    %1 = arith.extui %0 : i1 to i32
    %c0_i32_0 = arith.constant 0 : i32
    %2 = arith.cmpi ne, %1, %c0_i32_0 : i32
    scf.if %2 {
      %cst_9 = arith.constant 0.000000e+00 : f32
      %13 = vector.broadcast %cst_9 : f32 to vector<16x128xf32>
      %c0_10 = arith.constant 0 : index
      %c0_11 = arith.constant 0 : index
      %14 = vector.load %arg5[%c0_10, %c0_11] : memref<16x128xf32, #tpu.memory_space<vmem>>, vector<16x128xf32>
      tpu.vector_store %arg5[%c0_10, %c0_11], %13 {strides = array<i32>} : memref<16x128xf32, #tpu.memory_space<vmem>>, vector<16x128xf32>,
    } else {
    }
    %c0 = arith.constant 0 : index
    %c0_1 = arith.constant 0 : index
    %3 = vector.load %arg5[%c0, %c0_1] : memref<16x128xf32, #tpu.memory_space<vmem>>, vector<16x128xf32>
    %c0_2 = arith.constant 0 : index
    %c0_3 = arith.constant 0 : index
    %4 = vector.load %arg2[%c0_2, %c0_3] : memref<16x256xf32, #tpu.memory_space<vmem>>, vector<16x256xf32>
    %5 = arith.truncf %4 : vector<16x256xf32> to vector<16x256xbf16>
    %c0_4 = arith.constant 0 : index
    %c0_5 = arith.constant 0 : index
    %6 = vector.load %arg3[%c0_4, %c0_5] : memref<256x128xbf16, #tpu.memory_space<vmem>>, vector<256x128xbf16>
    %cst = arith.constant dense<0.000000e+00> : vector<16x128xf32>
    %7 = tpu.matmul %5, %6, %cst {dimension_numbers = #tpu.dot_dimension_numbers<[1], [0], [0], [1], [0, 0, 1, 1], [], []>} : vector<16x256xbf16>, vector<256x128xbf16>, vector<16x128xf32> -> vector<16x128xf32>
    %8 = arith.addf %3, %7 : vector<16x128xf32>
    %c0_6 = arith.constant 0 : index
    %c0_7 = arith.constant 0 : index
    %9 = vector.load %arg5[%c0_6, %c0_7] : memref<16x128xf32, #tpu.memory_space<vmem>>, vector<16x128xf32>
    tpu.vector_store %arg5[%c0_6, %c0_7], %8 {strides = array<i32>} : memref<16x128xf32, #tpu.memory_space<vmem>>, vector<16x128xf32>,
    %c3_i32 = arith.constant 3 : i32
    %10 = arith.cmpi eq, %arg1, %c3_i32 : i32
    %11 = arith.extui %10 : i1 to i32
    %c0_i32_8 = arith.constant 0 : i32
    %12 = arith.cmpi ne, %11, %c0_i32_8 : i32
    scf.if %12 {
      %c0_9 = arith.constant 0 : index
      %c0_10 = arith.constant 0 : index
      %13 = vector.load %arg5[%c0_9, %c0_10] : memref<16x128xf32, #tpu.memory_space<vmem>>, vector<16x128xf32>
      %c0_11 = arith.constant 0 : index
      %c0_12 = arith.constant 0 : index
      %14 = vector.load %arg4[%c0_11, %c0_12] : memref<1x128xf32, #tpu.memory_space<vmem>>, vector<1x128xf32>
      %15 = vector.broadcast %14 : vector<1x128xf32> to vector<16x128xf32>
      %16 = arith.addf %13, %15 : vector<16x128xf32>
      %c0_13 = arith.constant 0 : index
      %c0_14 = arith.constant 0 : index
      %17 = vector.load %arg5[%c0_13, %c0_14] : memref<16x128xf32, #tpu.memory_space<vmem>>, vector<16x128xf32>
      tpu.vector_store %arg5[%c0_13, %c0_14], %16 {strides = array<i32>} : memref<16x128xf32, #tpu.memory_space<vmem>>, vector<16x128xf32>,
    } else {
    }
    return
  }
  func.func @transform_0(%arg0: i32, %arg1: i32) -> (i32, i32) {
    %c0_i32 = arith.constant 0 : i32
    return %arg0, %arg1 : i32, i32
  }
  func.func @transform_1(%arg0: i32, %arg1: i32) -> (i32, i32) {
    %c0_i32 = arith.constant 0 : i32
    %c0_i32_0 = arith.constant 0 : i32
    return %arg1, %c0_i32 : i32, i32
  }
  func.func @transform_2(%arg0: i32, %arg1: i32) -> (i32, i32) {
    %c0_i32 = arith.constant 0 : i32
    %c0_i32_0 = arith.constant 0 : i32
    %c0_i32_1 = arith.constant 0 : i32
    return %c0_i32, %c0_i32_0 : i32, i32
  }
  func.func @transform_3(%arg0: i32, %arg1: i32) -> (i32, i32) {
    %c0_i32 = arith.constant 0 : i32
    %c0_i32_0 = arith.constant 0 : i32
    return %arg0, %c0_i32 : i32, i32
  }
}

module attributes {stable_mosaic.version = 11 : i64} {
  func.func @head_kernel(%arg0: i32, %arg1: memref<1x8x128xf32, #tpu.memory_space<vmem>>, %arg2: memref<128x256xbf16, #tpu.memory_space<vmem>>, %arg3: memref<1x256xf32, #tpu.memory_space<vmem>>, %arg4: memref<1x256xf32, #tpu.memory_space<vmem>>, %arg5: memref<256x256xbf16, #tpu.memory_space<vmem>>, %arg6: memref<1x256xf32, #tpu.memory_space<vmem>>, %arg7: memref<1x256xf32, #tpu.memory_space<vmem>>, %arg8: memref<256x256xbf16, #tpu.memory_space<vmem>>, %arg9: memref<256x128xbf16, #tpu.memory_space<vmem>>, %arg10: memref<1x128xf32, #tpu.memory_space<vmem>>, %arg11: memref<1x128xf32, #tpu.memory_space<vmem>>, %arg12: memref<128x256xbf16, #tpu.memory_space<vmem>>, %arg13: memref<1x256xf32, #tpu.memory_space<vmem>>, %arg14: memref<1x8x256xf32, #tpu.memory_space<vmem>>, %arg15: memref<1x8x256xf32, #tpu.memory_space<vmem>>) attributes {dimension_semantics = [#tpu.dimension_semantics<parallel>], iteration_bounds = array<i64: 2>, scalar_prefetch = 0 : i64, scratch_operands = 0 : i64, tpu.core_type = #tpu.core_type<tc>, window_params = [{transform_indices = @transform_0, window_bounds = array<i64: 1, 8, 128>}, {pipeline_mode = #tpu.pipeline_mode<synchronous>, transform_indices = @transform_1, window_bounds = array<i64: 128, 256>}, {pipeline_mode = #tpu.pipeline_mode<synchronous>, transform_indices = @transform_2, window_bounds = array<i64: 1, 256>}, {pipeline_mode = #tpu.pipeline_mode<synchronous>, transform_indices = @transform_3, window_bounds = array<i64: 1, 256>}, {pipeline_mode = #tpu.pipeline_mode<synchronous>, transform_indices = @transform_4, window_bounds = array<i64: 256, 256>}, {pipeline_mode = #tpu.pipeline_mode<synchronous>, transform_indices = @transform_5, window_bounds = array<i64: 1, 256>}, {pipeline_mode = #tpu.pipeline_mode<synchronous>, transform_indices = @transform_6, window_bounds = array<i64: 1, 256>}, {pipeline_mode = #tpu.pipeline_mode<synchronous>, transform_indices = @transform_7, window_bounds = array<i64: 256, 256>}, {pipeline_mode = #tpu.pipeline_mode<synchronous>, transform_indices = @transform_8, window_bounds = array<i64: 256, 128>}, {pipeline_mode = #tpu.pipeline_mode<synchronous>, transform_indices = @transform_9, window_bounds = array<i64: 1, 128>}, {pipeline_mode = #tpu.pipeline_mode<synchronous>, transform_indices = @transform_10, window_bounds = array<i64: 1, 128>}, {pipeline_mode = #tpu.pipeline_mode<synchronous>, transform_indices = @transform_11, window_bounds = array<i64: 128, 256>}, {pipeline_mode = #tpu.pipeline_mode<synchronous>, transform_indices = @transform_12, window_bounds = array<i64: 1, 256>}, {transform_indices = @transform_13, window_bounds = array<i64: 1, 8, 256>}, {transform_indices = @transform_14, window_bounds = array<i64: 1, 8, 256>}]} {
    %c0 = arith.constant 0 : index
    %c0_0 = arith.constant 0 : index
    %c0_1 = arith.constant 0 : index
    %0 = vector.load %arg1[%c0, %c0_0, %c0_1] : memref<1x8x128xf32, #tpu.memory_space<vmem>>, vector<1x8x128xf32>
    %1 = vector.shape_cast %0 : vector<1x8x128xf32> to vector<8x128xf32>
    %2 = arith.truncf %1 : vector<8x128xf32> to vector<8x128xbf16>
    %c0_2 = arith.constant 0 : index
    %c0_3 = arith.constant 0 : index
    %3 = vector.load %arg2[%c0_2, %c0_3] : memref<128x256xbf16, #tpu.memory_space<vmem>>, vector<128x256xbf16>
    %cst = arith.constant dense<0.000000e+00> : vector<8x256xf32>
    %4 = tpu.matmul %2, %3, %cst {dimension_numbers = #tpu.dot_dimension_numbers<[1], [0], [0], [1], [0, 0, 1, 1], [], []>} : vector<8x128xbf16>, vector<128x256xbf16>, vector<8x256xf32> -> vector<8x256xf32>
    %c0_4 = arith.constant 0 : index
    %c0_5 = arith.constant 0 : index
    %5 = vector.load %arg3[%c0_4, %c0_5] : memref<1x256xf32, #tpu.memory_space<vmem>>, vector<1x256xf32>
    %c0_6 = arith.constant 0 : index
    %c0_7 = arith.constant 0 : index
    %6 = vector.load %arg4[%c0_6, %c0_7] : memref<1x256xf32, #tpu.memory_space<vmem>>, vector<1x256xf32>
    %cst_8 = arith.constant dense<0.000000e+00> : vector<256xf32>
    %7 = vector.multi_reduction <add>, %4, %cst_8 [0] : vector<8x256xf32> to vector<256xf32>
    %8 = vector.shape_cast %7 : vector<256xf32> to vector<1x256xf32>
    %cst_9 = arith.constant 8.000000e+00 : f32
    %9 = vector.broadcast %cst_9 : f32 to vector<1x256xf32>
    %10 = arith.divf %8, %9 : vector<1x256xf32>
    %11 = vector.broadcast %10 : vector<1x256xf32> to vector<8x256xf32>
    %12 = arith.subf %4, %11 : vector<8x256xf32>
    %13 = arith.mulf %12, %12 : vector<8x256xf32>
    %cst_10 = arith.constant dense<0.000000e+00> : vector<256xf32>
    %14 = vector.multi_reduction <add>, %13, %cst_10 [0] : vector<8x256xf32> to vector<256xf32>
    %15 = vector.shape_cast %14 : vector<256xf32> to vector<1x256xf32>
    %cst_11 = arith.constant 8.000000e+00 : f32
    %16 = vector.broadcast %cst_11 : f32 to vector<1x256xf32>
    %17 = arith.divf %15, %16 : vector<1x256xf32>
    %18 = vector.broadcast %10 : vector<1x256xf32> to vector<8x256xf32>
    %19 = arith.subf %4, %18 : vector<8x256xf32>
    %cst_12 = arith.constant 9.99999974E-6 : f32
    %20 = vector.broadcast %cst_12 : f32 to vector<1x256xf32>
    %21 = arith.addf %17, %20 : vector<1x256xf32>
    %22 = math.rsqrt %21 : vector<1x256xf32>
    %23 = vector.broadcast %22 : vector<1x256xf32> to vector<8x256xf32>
    %24 = arith.mulf %19, %23 : vector<8x256xf32>
    %25 = vector.broadcast %5 : vector<1x256xf32> to vector<8x256xf32>
    %26 = arith.mulf %24, %25 : vector<8x256xf32>
    %27 = vector.broadcast %6 : vector<1x256xf32> to vector<8x256xf32>
    %28 = arith.addf %26, %27 : vector<8x256xf32>
    %cst_13 = arith.constant 0.000000e+00 : f32
    %29 = vector.broadcast %cst_13 : f32 to vector<8x256xf32>
    %30 = arith.maximumf %28, %29 : vector<8x256xf32>
    %31 = arith.truncf %30 : vector<8x256xf32> to vector<8x256xbf16>
    %c0_14 = arith.constant 0 : index
    %c0_15 = arith.constant 0 : index
    %32 = vector.load %arg5[%c0_14, %c0_15] : memref<256x256xbf16, #tpu.memory_space<vmem>>, vector<256x256xbf16>
    %cst_16 = arith.constant dense<0.000000e+00> : vector<8x256xf32>
    %33 = tpu.matmul %31, %32, %cst_16 {dimension_numbers = #tpu.dot_dimension_numbers<[1], [0], [0], [1], [0, 0, 1, 1], [], []>} : vector<8x256xbf16>, vector<256x256xbf16>, vector<8x256xf32> -> vector<8x256xf32>
    %c0_17 = arith.constant 0 : index
    %c0_18 = arith.constant 0 : index
    %34 = vector.load %arg6[%c0_17, %c0_18] : memref<1x256xf32, #tpu.memory_space<vmem>>, vector<1x256xf32>
    %c0_19 = arith.constant 0 : index
    %c0_20 = arith.constant 0 : index
    %35 = vector.load %arg7[%c0_19, %c0_20] : memref<1x256xf32, #tpu.memory_space<vmem>>, vector<1x256xf32>
    %cst_21 = arith.constant dense<0.000000e+00> : vector<256xf32>
    %36 = vector.multi_reduction <add>, %33, %cst_21 [0] : vector<8x256xf32> to vector<256xf32>
    %37 = vector.shape_cast %36 : vector<256xf32> to vector<1x256xf32>
    %cst_22 = arith.constant 8.000000e+00 : f32
    %38 = vector.broadcast %cst_22 : f32 to vector<1x256xf32>
    %39 = arith.divf %37, %38 : vector<1x256xf32>
    %40 = vector.broadcast %39 : vector<1x256xf32> to vector<8x256xf32>
    %41 = arith.subf %33, %40 : vector<8x256xf32>
    %42 = arith.mulf %41, %41 : vector<8x256xf32>
    %cst_23 = arith.constant dense<0.000000e+00> : vector<256xf32>
    %43 = vector.multi_reduction <add>, %42, %cst_23 [0] : vector<8x256xf32> to vector<256xf32>
    %44 = vector.shape_cast %43 : vector<256xf32> to vector<1x256xf32>
    %cst_24 = arith.constant 8.000000e+00 : f32
    %45 = vector.broadcast %cst_24 : f32 to vector<1x256xf32>
    %46 = arith.divf %44, %45 : vector<1x256xf32>
    %47 = vector.broadcast %39 : vector<1x256xf32> to vector<8x256xf32>
    %48 = arith.subf %33, %47 : vector<8x256xf32>
    %cst_25 = arith.constant 9.99999974E-6 : f32
    %49 = vector.broadcast %cst_25 : f32 to vector<1x256xf32>
    %50 = arith.addf %46, %49 : vector<1x256xf32>
    %51 = math.rsqrt %50 : vector<1x256xf32>
    %52 = vector.broadcast %51 : vector<1x256xf32> to vector<8x256xf32>
    %53 = arith.mulf %48, %52 : vector<8x256xf32>
    %54 = vector.broadcast %34 : vector<1x256xf32> to vector<8x256xf32>
    %55 = arith.mulf %53, %54 : vector<8x256xf32>
    %56 = vector.broadcast %35 : vector<1x256xf32> to vector<8x256xf32>
    %57 = arith.addf %55, %56 : vector<8x256xf32>
    %cst_26 = arith.constant 0.000000e+00 : f32
    %58 = vector.broadcast %cst_26 : f32 to vector<8x256xf32>
    %59 = arith.maximumf %57, %58 : vector<8x256xf32>
    %60 = arith.truncf %59 : vector<8x256xf32> to vector<8x256xbf16>
    %c0_27 = arith.constant 0 : index
    %c0_28 = arith.constant 0 : index
    %61 = vector.load %arg8[%c0_27, %c0_28] : memref<256x256xbf16, #tpu.memory_space<vmem>>, vector<256x256xbf16>
    %cst_29 = arith.constant dense<0.000000e+00> : vector<8x256xf32>
    %62 = tpu.matmul %60, %61, %cst_29 {dimension_numbers = #tpu.dot_dimension_numbers<[1], [0], [0], [1], [0, 0, 1, 1], [], []>} : vector<8x256xbf16>, vector<256x256xbf16>, vector<8x256xf32> -> vector<8x256xf32>
    %cst_30 = arith.constant dense<0.000000e+00> : vector<256xf32>
    %63 = vector.multi_reduction <add>, %62, %cst_30 [0] : vector<8x256xf32> to vector<256xf32>
    %64 = vector.shape_cast %63 : vector<256xf32> to vector<1x256xf32>
    %cst_31 = arith.constant 8.000000e+00 : f32
    %65 = vector.broadcast %cst_31 : f32 to vector<1x256xf32>
    %66 = arith.divf %64, %65 : vector<1x256xf32>
    %67 = vector.broadcast %66 : vector<1x256xf32> to vector<8x256xf32>
    %68 = arith.subf %62, %67 : vector<8x256xf32>
    %69 = arith.mulf %68, %68 : vector<8x256xf32>
    %cst_32 = arith.constant dense<0.000000e+00> : vector<256xf32>
    %70 = vector.multi_reduction <add>, %69, %cst_32 [0] : vector<8x256xf32> to vector<256xf32>
    %71 = vector.shape_cast %70 : vector<256xf32> to vector<1x256xf32>
    %cst_33 = arith.constant 8.000000e+00 : f32
    %72 = vector.broadcast %cst_33 : f32 to vector<1x256xf32>
    %73 = arith.divf %71, %72 : vector<1x256xf32>
    %74 = vector.broadcast %66 : vector<1x256xf32> to vector<8x256xf32>
    %75 = arith.subf %62, %74 : vector<8x256xf32>
    %cst_34 = arith.constant 9.99999974E-6 : f32
    %76 = vector.broadcast %cst_34 : f32 to vector<1x256xf32>
    %77 = arith.addf %73, %76 : vector<1x256xf32>
    %78 = math.rsqrt %77 : vector<1x256xf32>
    %79 = vector.broadcast %78 : vector<1x256xf32> to vector<8x256xf32>
    %80 = arith.mulf %75, %79 : vector<8x256xf32>
    %c0_35 = arith.constant 0 : index
    %c0_36 = arith.constant 0 : index
    %c0_37 = arith.constant 0 : index
    %81 = vector.load %arg14[%c0_35, %c0_36, %c0_37] : memref<1x8x256xf32, #tpu.memory_space<vmem>>, vector<1x8x256xf32>
    %82 = vector.shape_cast %81 : vector<1x8x256xf32> to vector<8x256xf32>
    %83 = vector.shape_cast %80 : vector<8x256xf32> to vector<1x8x256xf32>
    tpu.vector_store %arg14[%c0_35, %c0_36, %c0_37], %83 {strides = array<i32>} : memref<1x8x256xf32, #tpu.memory_space<vmem>>, vector<1x8x256xf32>,
    %84 = arith.truncf %80 : vector<8x256xf32> to vector<8x256xbf16>
    %c0_38 = arith.constant 0 : index
    %c0_39 = arith.constant 0 : index
    %85 = vector.load %arg9[%c0_38, %c0_39] : memref<256x128xbf16, #tpu.memory_space<vmem>>, vector<256x128xbf16>
    %cst_40 = arith.constant dense<0.000000e+00> : vector<8x128xf32>
    %86 = tpu.matmul %84, %85, %cst_40 {dimension_numbers = #tpu.dot_dimension_numbers<[1], [0], [0], [1], [0, 0, 1, 1], [], []>} : vector<8x256xbf16>, vector<256x128xbf16>, vector<8x128xf32> -> vector<8x128xf32>
    %c0_41 = arith.constant 0 : index
    %c0_42 = arith.constant 0 : index
    %87 = vector.load %arg10[%c0_41, %c0_42] : memref<1x128xf32, #tpu.memory_space<vmem>>, vector<1x128xf32>
    %c0_43 = arith.constant 0 : index
    %c0_44 = arith.constant 0 : index
    %88 = vector.load %arg11[%c0_43, %c0_44] : memref<1x128xf32, #tpu.memory_space<vmem>>, vector<1x128xf32>
    %cst_45 = arith.constant dense<0.000000e+00> : vector<128xf32>
    %89 = vector.multi_reduction <add>, %86, %cst_45 [0] : vector<8x128xf32> to vector<128xf32>
    %90 = vector.shape_cast %89 : vector<128xf32> to vector<1x128xf32>
    %cst_46 = arith.constant 8.000000e+00 : f32
    %91 = vector.broadcast %cst_46 : f32 to vector<1x128xf32>
    %92 = arith.divf %90, %91 : vector<1x128xf32>
    %93 = vector.broadcast %92 : vector<1x128xf32> to vector<8x128xf32>
    %94 = arith.subf %86, %93 : vector<8x128xf32>
    %95 = arith.mulf %94, %94 : vector<8x128xf32>
    %cst_47 = arith.constant dense<0.000000e+00> : vector<128xf32>
    %96 = vector.multi_reduction <add>, %95, %cst_47 [0] : vector<8x128xf32> to vector<128xf32>
    %97 = vector.shape_cast %96 : vector<128xf32> to vector<1x128xf32>
    %cst_48 = arith.constant 8.000000e+00 : f32
    %98 = vector.broadcast %cst_48 : f32 to vector<1x128xf32>
    %99 = arith.divf %97, %98 : vector<1x128xf32>
    %100 = vector.broadcast %92 : vector<1x128xf32> to vector<8x128xf32>
    %101 = arith.subf %86, %100 : vector<8x128xf32>
    %cst_49 = arith.constant 9.99999974E-6 : f32
    %102 = vector.broadcast %cst_49 : f32 to vector<1x128xf32>
    %103 = arith.addf %99, %102 : vector<1x128xf32>
    %104 = math.rsqrt %103 : vector<1x128xf32>
    %105 = vector.broadcast %104 : vector<1x128xf32> to vector<8x128xf32>
    %106 = arith.mulf %101, %105 : vector<8x128xf32>
    %107 = vector.broadcast %87 : vector<1x128xf32> to vector<8x128xf32>
    %108 = arith.mulf %106, %107 : vector<8x128xf32>
    %109 = vector.broadcast %88 : vector<1x128xf32> to vector<8x128xf32>
    %110 = arith.addf %108, %109 : vector<8x128xf32>
    %cst_50 = arith.constant 0.000000e+00 : f32
    %111 = vector.broadcast %cst_50 : f32 to vector<8x128xf32>
    %112 = arith.maximumf %110, %111 : vector<8x128xf32>
    %113 = arith.truncf %112 : vector<8x128xf32> to vector<8x128xbf16>
    %c0_51 = arith.constant 0 : index
    %c0_52 = arith.constant 0 : index
    %114 = vector.load %arg12[%c0_51, %c0_52] : memref<128x256xbf16, #tpu.memory_space<vmem>>, vector<128x256xbf16>
    %cst_53 = arith.constant dense<0.000000e+00> : vector<8x256xf32>
    %115 = tpu.matmul %113, %114, %cst_53 {dimension_numbers = #tpu.dot_dimension_numbers<[1], [0], [0], [1], [0, 0, 1, 1], [], []>} : vector<8x128xbf16>, vector<128x256xbf16>, vector<8x256xf32> -> vector<8x256xf32>
    %c0_54 = arith.constant 0 : index
    %c0_55 = arith.constant 0 : index
    %116 = vector.load %arg13[%c0_54, %c0_55] : memref<1x256xf32, #tpu.memory_space<vmem>>, vector<1x256xf32>
    %117 = vector.broadcast %116 : vector<1x256xf32> to vector<8x256xf32>
    %118 = arith.addf %115, %117 : vector<8x256xf32>
    %c0_56 = arith.constant 0 : index
    %c0_57 = arith.constant 0 : index
    %c0_58 = arith.constant 0 : index
    %119 = vector.load %arg15[%c0_56, %c0_57, %c0_58] : memref<1x8x256xf32, #tpu.memory_space<vmem>>, vector<1x8x256xf32>
    %120 = vector.shape_cast %119 : vector<1x8x256xf32> to vector<8x256xf32>
    %121 = vector.shape_cast %118 : vector<8x256xf32> to vector<1x8x256xf32>
    tpu.vector_store %arg15[%c0_56, %c0_57, %c0_58], %121 {strides = array<i32>} : memref<1x8x256xf32, #tpu.memory_space<vmem>>, vector<1x8x256xf32>,
    return
  }
  func.func @transform_0(%arg0: i32) -> (i32, i32, i32) {
    %c0_i32 = arith.constant 0 : i32
    %c0_i32_0 = arith.constant 0 : i32
    %c0_i32_1 = arith.constant 0 : i32
    return %arg0, %c0_i32, %c0_i32_0 : i32, i32, i32
  }
  func.func @transform_1(%arg0: i32) -> (i32, i32) {
    %c0_i32 = arith.constant 0 : i32
    %c0_i32_0 = arith.constant 0 : i32
    %c0_i32_1 = arith.constant 0 : i32
    return %c0_i32, %c0_i32_0 : i32, i32
  }
  func.func @transform_2(%arg0: i32) -> (i32, i32) {
    %c0_i32 = arith.constant 0 : i32
    %c0_i32_0 = arith.constant 0 : i32
    %c0_i32_1 = arith.constant 0 : i32
    return %c0_i32, %c0_i32_0 : i32, i32
  }
  func.func @transform_3(%arg0: i32) -> (i32, i32) {
    %c0_i32 = arith.constant 0 : i32
    %c0_i32_0 = arith.constant 0 : i32
    %c0_i32_1 = arith.constant 0 : i32
    return %c0_i32, %c0_i32_0 : i32, i32
  }
  func.func @transform_4(%arg0: i32) -> (i32, i32) {
    %c0_i32 = arith.constant 0 : i32
    %c0_i32_0 = arith.constant 0 : i32
    %c0_i32_1 = arith.constant 0 : i32
    return %c0_i32, %c0_i32_0 : i32, i32
  }
  func.func @transform_5(%arg0: i32) -> (i32, i32) {
    %c0_i32 = arith.constant 0 : i32
    %c0_i32_0 = arith.constant 0 : i32
    %c0_i32_1 = arith.constant 0 : i32
    return %c0_i32, %c0_i32_0 : i32, i32
  }
  func.func @transform_6(%arg0: i32) -> (i32, i32) {
    %c0_i32 = arith.constant 0 : i32
    %c0_i32_0 = arith.constant 0 : i32
    %c0_i32_1 = arith.constant 0 : i32
    return %c0_i32, %c0_i32_0 : i32, i32
  }
  func.func @transform_7(%arg0: i32) -> (i32, i32) {
    %c0_i32 = arith.constant 0 : i32
    %c0_i32_0 = arith.constant 0 : i32
    %c0_i32_1 = arith.constant 0 : i32
    return %c0_i32, %c0_i32_0 : i32, i32
  }
  func.func @transform_8(%arg0: i32) -> (i32, i32) {
    %c0_i32 = arith.constant 0 : i32
    %c0_i32_0 = arith.constant 0 : i32
    %c0_i32_1 = arith.constant 0 : i32
    return %c0_i32, %c0_i32_0 : i32, i32
  }
  func.func @transform_9(%arg0: i32) -> (i32, i32) {
    %c0_i32 = arith.constant 0 : i32
    %c0_i32_0 = arith.constant 0 : i32
    %c0_i32_1 = arith.constant 0 : i32
    return %c0_i32, %c0_i32_0 : i32, i32
  }
  func.func @transform_10(%arg0: i32) -> (i32, i32) {
    %c0_i32 = arith.constant 0 : i32
    %c0_i32_0 = arith.constant 0 : i32
    %c0_i32_1 = arith.constant 0 : i32
    return %c0_i32, %c0_i32_0 : i32, i32
  }
  func.func @transform_11(%arg0: i32) -> (i32, i32) {
    %c0_i32 = arith.constant 0 : i32
    %c0_i32_0 = arith.constant 0 : i32
    %c0_i32_1 = arith.constant 0 : i32
    return %c0_i32, %c0_i32_0 : i32, i32
  }
  func.func @transform_12(%arg0: i32) -> (i32, i32) {
    %c0_i32 = arith.constant 0 : i32
    %c0_i32_0 = arith.constant 0 : i32
    %c0_i32_1 = arith.constant 0 : i32
    return %c0_i32, %c0_i32_0 : i32, i32
  }
  func.func @transform_13(%arg0: i32) -> (i32, i32, i32) {
    %c0_i32 = arith.constant 0 : i32
    %c0_i32_0 = arith.constant 0 : i32
    %c0_i32_1 = arith.constant 0 : i32
    return %arg0, %c0_i32, %c0_i32_0 : i32, i32, i32
  }
  func.func @transform_14(%arg0: i32) -> (i32, i32, i32) {
    %c0_i32 = arith.constant 0 : i32
    %c0_i32_0 = arith.constant 0 : i32
    %c0_i32_1 = arith.constant 0 : i32
    return %arg0, %c0_i32, %c0_i32_0 : i32, i32, i32
  }
}

</mosaic_0001>

<bundles_post_ra>
// kernel: simsiam_forward.2
= control target key start
LH: loop header
LB: loop body
LE: loop exit
PB: predicated region body
PF: predicated region fallthrough
CT: control target
= control target key end

     0   :  { %s701_s12 = smov 0   ;;  %s703_s13 = smov 0   ;;  %s825_s0 = inlined_call_operand.vmem [shape: f32[16,1024], index: 0, kind: input, shape index: {}]   ;;  %s826_s1 = inlined_call_operand.vmem [shape: bf16[1024,128], index: 1, kind: input, shape index: {}]   ;;  %s827_s2 = inlined_call_operand.vmem [shape: f32[1,128], index: 2, kind: input, shape index: {}]   ;;  %s828_s3 = inlined_call_operand.vmem [shape: f32[16,128], index: 3, kind: output, shape index: {}]  }
   0x1   :  { %s705_s14 = smov 0   ;;  %s707_s15 = smov 0  }
   0x2   :  { %s709_s16 = smov 0  }
   0x3 LB: > { %s22_s17 = sadd.s32 1, %s674_s15  ;;  %p41_p1 = scmp.ne.s32.totalorder %s666_s13, %s662_s12  ;;  %s678_s16 = sphi %s709_s16, %s13_s16   ;;  %s674_s15 = sphi %s707_s15, %s832_s15   ;;  %s670_s14 = sphi %s705_s14, %s831_s14   ;;  %s666_s13 = sphi %s703_s13, %s830_s13   ;;  %s662_s12 = sphi %s701_s12, %s829_s12  }
   0x4   : > { %p23_p0 = scmp.ge.s32.totalorder %s22_s17, 4  ;;  %p42_p2 = scmp.eq.s32.totalorder %s678_s16, 0 }
   0x5   : > { %s34_s19 = sadd.s32 1, %s666_s13  ;;  %p529_p5 = scmp.ge.s32.totalorder %s678_s16, 4 }
   0x6   : > { %s834_s17 = smov (%p23_p0, %s22_s17), 0  ;;  %p43_p3 = por %p42_p2, %p41_p1 }
   0x7   : > { %s30_s18 = ssub.s32 %s674_s15, %s834_s17  ;;  %143 = sbr.rel (%p529_p5) target bundleno = 21 (0x15), region = 20 }
   0x8   : > { %p32_p4 = scmp.eq.s32.totalorder %s30_s18, 0 }
   0xa   : > { %s736_s20 = scalar_select %p32_p4, %s666_s13, %s34_s19  }
   0xe   : > { %146 = sbr.rel (!%p43_p3) target bundleno = 21 (0x15), region = 24  ;;  %s148_s21 = sand.u32 (%p43_p3), 1, %s666_s13  }
   0xf   : > { %s560_s22 = sshll.u32 (%p43_p3), %s674_s15, 4  ;;  %s530_s23 = sshll.u32 (%p43_p3), %s148_s21, 5 }
  0x10   : > { %s156_s26 = scalar_lea.vmem (%p43_p3), %s825_s0, %s560_s22  ;;  %s150_s27 = scalar_lea.vmem (%p43_p3), [#allocation2], %s530_s23 }
  0x11   : > { %v169_v0 = vld [vmem:[%s156_s26] sm:$0xff] (%p43_p3)  ;;  %v171_v1 = vld [vmem:[%s156_s26 + $0x8] sm:$0xff] (%p43_p3) }
  0x12   : > { %v173_v2 = vld [vmem:[%s156_s26 + $0x40] sm:$0xff] (%p43_p3)  ;;  %170 = vst [vmem:[%s150_s27] sm:$0xff] (%p43_p3), %v169_v0  ;;  %172 = vst [vmem:[%s150_s27 + $0x8] sm:$0xff] (%p43_p3), %v171_v1  ;;  %v175_v3 = vld [vmem:[%s156_s26 + $0x48] sm:$0xff] (%p43_p3) }
  0x13   : > { %174 = vst [vmem:[%s150_s27 + $0x10] sm:$0xff] (%p43_p3), %v173_v2  ;;  %176 = vst [vmem:[%s150_s27 + $0x18] sm:$0xff] (%p43_p3), %v175_v3 }
  0x15 PF: > { %p533_p6 = scmp.ge.s32.totalorder %s678_s16, 1  ;;  %p190_p7 = scmp.lt.s32.totalorder %s678_s16, 5 }
  0x17   : > { %p191_p8 = pnand %p533_p6, %p190_p7 }
  0x18   : > { %s197_s28 = sand.u32 (!%p191_p8), 1, %s662_s12   ;;  %s535_s29 = sshll.u32 (!%p191_p8), %s670_s14, 5 }
  0x19   : > { %194 = sbr.rel (%p191_p8) target bundleno = 302 (0x12e), region = 51  ;;  %s534_s30 = sshll.u32 (!%p191_p8), %s197_s28, 5 }
  0x1a   : > { %p228_p9 = scmp.lt.s32.totalorder (!%p191_p8), %s535_s29, 127  ;;  %s753_s8 = scalar_lea.vmem (!%p191_p8), [#allocation2], %s534_s30 }
  0x1b   : > { %p537_p10 = scmp.ne.s32.totalorder (!%p191_p8), %s670_s14, 0 }
  0x20   : > { %s836_s29 = smov (!%p228_p9, %s535_s29), 127  ;;  %243 = sbr.rel (%p537_p10) target bundleno = 39 (0x27), region = 59 }
  0x21   : > { %s536_s4 = sshll.u32 %s836_s29, 2  ;;  %v680_v4 = vmov (!%p537_p10), 0.0  }
  0x22   : > { %s751_s7 = scalar_lea.vmem %s826_s1, %s536_s4  ;;  %244 = vst [vmem:[%s828_s3] sm:$0xff] (!%p537_p10), %v680_v4  ;;  %245 = vst [vmem:[%s828_s3 + $0x8] sm:$0xff] (!%p537_p10), %v680_v4 }
  0x27 PF: > { %v624_v5 = vld [vmem:[%s751_s7 + $0x40] sm:$0xff]   ;;  %v626_v7 = vld [vmem:[%s751_s7 + $0x48] sm:$0xff]   ;;  %v628_v9 = vld [vmem:[%s751_s7 + $0x50] sm:$0xff]   ;;  %p554_p11 = scmp.ne.s32.totalorder %s670_s14, 3 }
  0x28   : > { %v625_v6 = vld [vmem:[%s751_s7] sm:$0xff]   ;;  %561 = vmatprep.subr.bf16.mxu0 %v624_v5  ;;  %v627_v8 = vld [vmem:[%s751_s7 + $0x8] sm:$0xff]   ;;  %v629_v10 = vld [vmem:[%s751_s7 + $0x10] sm:$0xff]  }
  0x29   : > { %562 = vmatpush3.bf16.msra.mxu0 %v625_v6  ;;  %v630_v11 = vld [vmem:[%s751_s7 + $0x58] sm:$0xff]   ;;  %v632_v13 = vld [vmem:[%s751_s7 + $0x60] sm:$0xff]   ;;  %v634_v15 = vld [vmem:[%s751_s7 + $0x68] sm:$0xff]  }
  0x2a   : > { %563 = vmatprep.subr.bf16.mxu0 %v626_v7  ;;  %v631_v12 = vld [vmem:[%s751_s7 + $0x18] sm:$0xff]   ;;  %v633_v14 = vld [vmem:[%s751_s7 + $0x20] sm:$0xff]   ;;  %v249_v16 = vld [vmem:[%s753_s8 + $0x8] sm:$0xff] }
  0x2b   : > { %v251_v17 = vld [vmem:[%s753_s8 + $0x18] sm:$0xff]  ;;  %v635_v19 = vld [vmem:[%s751_s7 + $0x28] sm:$0xff]   ;;  %v636_v20 = vld [vmem:[%s751_s7 + $0x70] sm:$0xff]  }
  0x2c   : > { %v253_v18 = vpack.c.bf16 %v251_v17, %v249_v16  ;;  %v637_v21 = vld [vmem:[%s751_s7 + $0x30] sm:$0xff]   ;;  %v638_v22 = vld [vmem:[%s751_s7 + $0x78] sm:$0xff]   ;;  %v248_v24 = vld [vmem:[%s753_s8] sm:$0xff] }
  0x2d   : > { %564 = vmatpush3.bf16.msra.mxu0 %v627_v8  ;;  %v639_v23 = vld [vmem:[%s751_s7 + $0x38] sm:$0xff]   ;;  %v250_v25 = vld [vmem:[%s753_s8 + $0x10] sm:$0xff]  ;;  %v246_v28 = vld [vmem:[%s828_s3] sm:$0xff] }
  0x2e   : > { %565 = vmatprep.subr.bf16.mxu0 %v628_v9  ;;  %414 = vmatprep.mubr.bf16.mxu0 %v253_v18  ;;  %v252_v26 = vpack.c.bf16 %v250_v25, %v248_v24  ;;  %v247_v32 = vld [vmem:[%s828_s3 + $0x8] sm:$0xff]  ;;  %v555_v38 = vld [vmem:[%s827_s2] ss:$0 sm:$0xff] (!%p554_p11) }
  0x31   : > { %566 = vmatpush3.bf16.msra.mxu0 %v629_v10 }
  0x32   : > { %567 = vmatprep.subr.bf16.mxu0 %v630_v11 }
  0x35   : > { %568 = vmatpush3.bf16.msra.mxu0 %v631_v12 }
  0x36   : > { %569 = vmatprep.subr.bf16.mxu0 %v632_v13 }
  0x39   : > { %570 = vmatpush3.bf16.msra.mxu0 %v633_v14 }
  0x3a   : > { %571 = vmatprep.subr.bf16.mxu0 %v634_v15 }
  0x3d   : > { %572 = vmatpush3.bf16.msra.mxu0 %v635_v19 }
  0x3e   : > { %573 = vmatprep.subr.bf16.mxu0 %v636_v20 }
  0x41   : > { %574 = vmatpush3.bf16.msra.mxu0 %v637_v21 }
  0x42   : > { %575 = vmatprep.subr.bf16.mxu0 %v638_v22 }
  0x45   : > { %576 = vmatpush3.bf16.msra.mxu0 %v639_v23 }
  0x48   : > { %415 = vmatmul.mubr.bf16.vlgmr.msra.gmra.mrb[0].mxu0 %v252_v26 }
 0x11b   : > { %v577_v27 = vpop.f32.mrb[0].mxu0 }
 0x11c   : > { %v578_v29 = vpop.f32.mrb[1].mxu0 }
 0x11d   : > { %v579_v30 = vadd.f32 %v578_v29, %v577_v27  ;;  %v580_v31 = vpop.f32.mrb[2].mxu0  ;;  %430 = sbr.rel (%p554_p11) target bundleno = 302 (0x12e), region = 63 }
 0x11e   : > { %v581_v33 = vpop.f32.mrb[3].mxu0 }
 0x11f   : > { %v423_v34 = vadd.f32 %v579_v30, %v246_v28  ;;  %v582_v35 = vadd.f32 %v581_v33, %v580_v31 }
 0x121   : > { %425 = vst [vmem:[%s828_s3] sm:$0xff] %v423_v34  ;;  %v424_v36 = vadd.f32 %v582_v35, %v247_v32 }
 0x123   : > { %426 = vst [vmem:[%s828_s3 + $0x8] sm:$0xff] %v424_v36 }
 0x128   : > { %v431_v37 = vld [vmem:[%s828_s3] sm:$0xff] }
 0x129   : > { %v440_v40 = vadd.f32 %v555_v38, %v431_v37 }
 0x12a   : > { %v432_v39 = vld [vmem:[%s828_s3 + $0x8] sm:$0xff] }
 0x12b   : > { %v441_v41 = vadd.f32 %v555_v38, %v432_v39  ;;  %442 = vst [vmem:[%s828_s3] sm:$0xff] %v440_v40 }
 0x12d   : > { %443 = vst [vmem:[%s828_s3 + $0x8] sm:$0xff] %v441_v41 }
 0x12e PF: > { %s13_s16 = sadd.s32 1, %s678_s16   ;;  %s829_s12 = smov %s666_s13 }
 0x12f   : > { %p10_p12 = scmp.ge.s32.totalorder %s13_s16, 6   ;;  %s830_s13 = smov %s736_s20 }
 0x130   : > { %s831_s14 = smov %s674_s15  ;;  %s832_s15 = smov %s834_s17 }
 0x131   :  { %12 = sbr.rel (!%p10_p12) target bundleno = 3 (0x3), region = 101 }

// kernel: simsiam_forward.3
= control target key start
LH: loop header
LB: loop body
LE: loop exit
PB: predicated region body
PF: predicated region fallthrough
CT: control target
= control target key end

     0   :  { %s2128_s29 = smov 0   ;;  %s2533_s0 = inlined_call_operand.vmem [shape: f32[2,8,128], index: 0, kind: input, shape index: {}]   ;;  %s2534_s1 = inlined_call_operand.vmem [shape: bf16[128,256], index: 1, kind: input, shape index: {}]   ;;  %s2535_s2 = inlined_call_operand.vmem [shape: f32[1,256], index: 2, kind: input, shape index: {}]   ;;  %s2536_s3 = inlined_call_operand.vmem [shape: f32[1,256], index: 3, kind: input, shape index: {}]   ;;  %s2537_s4 = inlined_call_operand.vmem [shape: bf16[256,256], index: 4, kind: input, shape index: {}]   ;;  %s2538_s5 = inlined_call_operand.vmem [shape: f32[1,256], index: 5, kind: input, shape index: {}]   ;;  %s2539_s6 = inlined_call_operand.vmem [shape: f32[1,256], index: 6, kind: input, shape index: {}]   ;;  %s2540_s7 = inlined_call_operand.vmem [shape: bf16[256,256], index: 7, kind: input, shape index: {}]   ;;  %s2541_s8 = inlined_call_operand.vmem [shape: bf16[256,128], index: 8, kind: input, shape index: {}]   ;;  %s2542_s9 = inlined_call_operand.vmem [shape: f32[1,128], index: 9, kind: input, shape index: {}]   ;;  %s2543_s10 = inlined_call_operand.vmem [shape: f32[1,128], index: 10, kind: input, shape index: {}]   ;;  %s2544_s11 = inlined_call_operand.vmem [shape: bf16[128,256], index: 11, kind: input, shape index: {}]   ;;  %s2545_s12 = inlined_call_operand.vmem [shape: f32[1,256], index: 12, kind: input, shape index: {}]   ;;  %s2546_s13 = inlined_call_operand.vmem [shape: f32[2,8,256], index: 13, kind: output, shape index: {0}]   ;;  %s2547_s14 = inlined_call_operand.vmem [shape: f32[2,8,256], index: 14, kind: output, shape index: {1}]  }
   0x1 LB: > { %s1711_s30 = sadd.s32 4294967295, %s2050_s29   ;;  %p1715_p0 = scmp.ge.s32.totalorder %s2050_s29, 1  ;;  %s2050_s29 = sphi %s2128_s29, %s25_s29  }
   0x2   : > { %p414_p1 = scmp.lt.s32.totalorder %s2050_s29, 3 }
   0x4   : > { %p415_p2 = pnand %p1715_p0, %p414_p1 }
   0x5   : > { %v1870_v0 = vld [vmem:[%s2534_s1 + $0x4] ss:$8 sps:$4 sm:$0xff] (!%p415_p2)   ;;  %v1872_v1 = vld [vmem:[%s2534_s1] ss:$8 sps:$4 sm:$0xff] (!%p415_p2)   ;;  %v2052_v2 = vmov (!%p415_p2), 0   ;;  %p464_p3 = scmp.lt.s32.totalorder (!%p415_p2), %s1711_s30, 1 }
   0x6   : > { %418 = sbr.rel (%p415_p2) target bundleno = 1325 (0x52d), region = 72  ;;  %609 = vmatprep.mubr.bf16.mxu0 (!%p415_p2), %v2052_v2  ;;  %577 = vmatprep.subr.bf16.mxu0 (!%p415_p2), %v1870_v0  ;;  %v1873_v3 = vld [vmem:[%s2534_s1 + $0x14] ss:$8 sps:$4 sm:$0xff] (!%p415_p2)   ;;  %v1875_v4 = vld [vmem:[%s2534_s1 + $0x10] ss:$8 sps:$4 sm:$0xff] (!%p415_p2)  }
   0x7   : > { %578 = vmatpush1.bf16.msra.mxu0 (!%p415_p2), %v1872_v1  ;;  %v1876_v5 = vld [vmem:[%s2534_s1 + $0x24] ss:$8 sps:$4 sm:$0xff] (!%p415_p2)   ;;  %v1878_v6 = vld [vmem:[%s2534_s1 + $0x20] ss:$8 sps:$4 sm:$0xff] (!%p415_p2)   ;;  %v1879_v7 = vld [vmem:[%s2534_s1 + $0x34] ss:$8 sps:$4 sm:$0xff] (!%p415_p2)  }
   0x8   : > { %579 = vmatprep.subr.bf16.mxu0 (!%p415_p2), %v1873_v3  ;;  %v1881_v8 = vld [vmem:[%s2534_s1 + $0x30] ss:$8 sps:$4 sm:$0xff] (!%p415_p2)   ;;  %v1882_v9 = vld [vmem:[%s2534_s1 + $0x44] ss:$8 sps:$4 sm:$0xff] (!%p415_p2)   ;;  %v1896_v11 = vld [vmem:[%s2537_s4] ss:$8 sps:$4 sm:$0xff] (!%p415_p2)  }
   0x9   : > { %v1894_v10 = vld [vmem:[%s2537_s4 + $0x4] ss:$8 sps:$4 sm:$0xff] (!%p415_p2)   ;;  %v1884_v12 = vld [vmem:[%s2534_s1 + $0x40] ss:$8 sps:$4 sm:$0xff] (!%p415_p2)   ;;  %v1897_v13 = vld [vmem:[%s2537_s4 + $0x14] ss:$8 sps:$4 sm:$0xff] (!%p415_p2)  }
   0xa   : > { %881 = vmatprep.subr.bf16.mxu1 (!%p415_p2), %v1894_v10  ;;  %v1899_v14 = vld [vmem:[%s2537_s4 + $0x10] ss:$8 sps:$4 sm:$0xff] (!%p415_p2)   ;;  %v1885_v15 = vld [vmem:[%s2534_s1 + $0x54] ss:$8 sps:$4 sm:$0xff] (!%p415_p2)   ;;  %v1888_v17 = vld [vmem:[%s2534_s1 + $0x64] ss:$8 sps:$4 sm:$0xff] (!%p415_p2)  }
   0xb   : > { %580 = vmatpush1.bf16.msra.mxu0 (!%p415_p2), %v1875_v4  ;;  %882 = vmatpush1.bf16.msra.mxu1 (!%p415_p2), %v1896_v11  ;;  %v1887_v16 = vld [vmem:[%s2534_s1 + $0x50] ss:$8 sps:$4 sm:$0xff] (!%p415_p2)   ;;  %v1890_v18 = vld [vmem:[%s2534_s1 + $0x60] ss:$8 sps:$4 sm:$0xff] (!%p415_p2)   ;;  %v1891_v19 = vld [vmem:[%s2534_s1 + $0x74] ss:$8 sps:$4 sm:$0xff] (!%p415_p2)  }
   0xc   : > { %581 = vmatprep.subr.bf16.mxu0 (!%p415_p2), %v1876_v5  ;;  %883 = vmatprep.subr.bf16.mxu1 (!%p415_p2), %v1897_v13  ;;  %v1893_v20 = vld [vmem:[%s2534_s1 + $0x70] ss:$8 sps:$4 sm:$0xff] (!%p415_p2)   ;;  %v1900_v23 = vld [vmem:[%s2537_s4 + $0x24] ss:$8 sps:$4 sm:$0xff] (!%p415_p2)   ;;  %v1902_v24 = vld [vmem:[%s2537_s4 + $0x20] ss:$8 sps:$4 sm:$0xff] (!%p415_p2)  }
   0xd   : > { %s2549_s30 = smov (!%p464_p3, %s1711_s30), 1  ;;  %v1903_v25 = vld [vmem:[%s2537_s4 + $0x34] ss:$8 sps:$4 sm:$0xff]   ;;  %v1905_v26 = vld [vmem:[%s2537_s4 + $0x30] ss:$8 sps:$4 sm:$0xff]  }
   0xe   : > { %s1716_s21 = sshll.u32 %s2549_s30, 3  ;;  %v1906_v27 = vld [vmem:[%s2537_s4 + $0x44] ss:$8 sps:$4 sm:$0xff]   ;;  %v1908_v28 = vld [vmem:[%s2537_s4 + $0x40] ss:$8 sps:$4 sm:$0xff]   ;;  %s1837_s23 = sshll.u32 %s2549_s30, 4 }
   0xf   : > { %582 = vmatpush1.bf16.msra.mxu0 %v1878_v6  ;;  %884 = vmatpush1.bf16.msra.mxu1 %v1899_v14  ;;  %s467_s28 = scalar_lea.vmem %s2533_s0, %s1716_s21  ;;  %v1909_v29 = vld [vmem:[%s2537_s4 + $0x54] ss:$8 sps:$4 sm:$0xff]   ;;  %v1911_v30 = vld [vmem:[%s2537_s4 + $0x50] ss:$8 sps:$4 sm:$0xff]   ;;  %v1912_v31 = vld [vmem:[%s2537_s4 + $0x64] ss:$8 sps:$4 sm:$0xff]   ;;  %s472_s26 = scalar_lea.vmem %s2546_s13, %s1837_s23 }
  0x10   : > { %583 = vmatprep.subr.bf16.mxu0 %v1879_v7  ;;  %v479_v21 = vld [vmem:[%s467_s28] sm:$0xff]  ;;  %885 = vmatprep.subr.bf16.mxu1 %v1900_v23  ;;  %v1915_v33 = vld [vmem:[%s2537_s4 + $0x74] ss:$8 sps:$4 sm:$0xff]   ;;  %v1917_v34 = vld [vmem:[%s2537_s4 + $0x70] ss:$8 sps:$4 sm:$0xff]   ;;  %s477_s28 = scalar_lea.vmem %s2547_s14, %s1837_s23 }
  0x11   : > { %v480_v22 = vpack.c.bf16 %v479_v21, %v479_v21  ;;  %v1914_v32 = vld [vmem:[%s2537_s4 + $0x60] ss:$8 sps:$4 sm:$0xff]   ;;  %v1918_v35 = vld [vmem:[%s2537_s4 + $0x84] ss:$8 sps:$4 sm:$0xff]   ;;  %v1921_v37 = vld [vmem:[%s2537_s4 + $0x94] ss:$8 sps:$4 sm:$0xff]  }
  0x12   : > { %v1920_v36 = vld [vmem:[%s2537_s4 + $0x80] ss:$8 sps:$4 sm:$0xff]   ;;  %v1923_v38 = vld [vmem:[%s2537_s4 + $0x90] ss:$8 sps:$4 sm:$0xff]   ;;  %v1924_v39 = vld [vmem:[%s2537_s4 + $0xa4] ss:$8 sps:$4 sm:$0xff]  }
  0x13   : > { %584 = vmatpush1.bf16.msra.mxu0 %v1881_v8  ;;  %886 = vmatpush1.bf16.msra.mxu1 %v1902_v24  ;;  %v1926_v40 = vld [vmem:[%s2537_s4 + $0xa0] ss:$8 sps:$4 sm:$0xff]   ;;  %v1927_v41 = vld [vmem:[%s2537_s4 + $0xb4] ss:$8 sps:$4 sm:$0xff]   ;;  %v1929_v42 = vld [vmem:[%s2537_s4 + $0xb0] ss:$8 sps:$4 sm:$0xff]  }
  0x14   : > { %585 = vmatprep.subr.bf16.mxu0 %v1882_v9  ;;  %887 = vmatprep.subr.bf16.mxu1 %v1903_v25  ;;  %v1930_v43 = vld [vmem:[%s2537_s4 + $0xc4] ss:$8 sps:$4 sm:$0xff]   ;;  %v1932_v44 = vld [vmem:[%s2537_s4 + $0xc0] ss:$8 sps:$4 sm:$0xff]   ;;  %v1933_v45 = vld [vmem:[%s2537_s4 + $0xd4] ss:$8 sps:$4 sm:$0xff]  }
  0x15   : > { %v1935_v46 = vld [vmem:[%s2537_s4 + $0xd0] ss:$8 sps:$4 sm:$0xff]   ;;  %v1936_v47 = vld [vmem:[%s2537_s4 + $0xe4] ss:$8 sps:$4 sm:$0xff]   ;;  %v1938_v48 = vld [vmem:[%s2537_s4 + $0xe0] ss:$8 sps:$4 sm:$0xff]  }
  0x16   : > { %v1939_v49 = vld [vmem:[%s2537_s4 + $0xf4] ss:$8 sps:$4 sm:$0xff]   ;;  %v1941_v50 = vld [vmem:[%s2537_s4 + $0xf0] ss:$8 sps:$4 sm:$0xff]   ;;  %v1942_v51 = vld [vmem:[%s2540_s7] ss:$8 sps:$4 sm:$0xff]  }
  0x17   : > { %586 = vmatpush1.bf16.msra.mxu0 %v1884_v12  ;;  %888 = vmatpush1.bf16.msra.mxu1 %v1905_v26  ;;  %v1944_v52 = vld [vmem:[%s2540_s7 + $0x4] ss:$8 sps:$4 sm:$0xff]   ;;  %v1947_v53 = vld [vmem:[%s2540_s7 + $0x14] ss:$8 sps:$4 sm:$0xff]   ;;  %v1945_v54 = vld [vmem:[%s2540_s7 + $0x10] ss:$8 sps:$4 sm:$0xff]  }
  0x18   : > { %587 = vmatprep.subr.bf16.mxu0 %v1885_v15  ;;  %889 = vmatprep.subr.bf16.mxu1 %v1906_v27 }
  0x1b   : > { %588 = vmatpush1.bf16.msra.mxu0 %v1887_v16  ;;  %890 = vmatpush1.bf16.msra.mxu1 %v1908_v28  ;;  %v660_v28 = vlaneseq }
  0x1c   : > { %589 = vmatprep.subr.bf16.mxu0 %v1888_v17  ;;  %891 = vmatprep.subr.bf16.mxu1 %v1909_v29 }
  0x1f   : > { %590 = vmatpush1.bf16.msra.mxu0 %v1890_v18  ;;  %892 = vmatpush1.bf16.msra.mxu1 %v1911_v30 }
  0x20   : > { %591 = vmatprep.subr.bf16.mxu0 %v1891_v19  ;;  %893 = vmatprep.subr.bf16.mxu1 %v1912_v31  ;;  %v661_v31 = vshrl.u32 %v660_v28, 7 }
  0x23   : > { %592 = vmatpush1.bf16.msra.mxu0 %v1893_v20  ;;  %894 = vmatpush1.bf16.msra.mxu1 %v1914_v32  ;;  %v2303_v32 = vsub.s32 0, %v661_v31 }
  0x24   : > { %895 = vmatprep.subr.bf16.mxu1 %v1915_v33  ;;  %1184 = vmatprep.subr.bf16.mxu0 %v1944_v52  ;;  %v618_v33 = vld [vmem:[%s2535_s2] sm:$0x3]  ;;  %v1950_v52 = vld [vmem:[%s2540_s7 + $0x24] ss:$8 sps:$4 sm:$0xff]  }
  0x26   : > { %610 = vmatmul.mubr.bf16.vlgmr.msra.gmra.mrb[0].mxu0 %v480_v22 }
  0x27   : > { %896 = vmatpush1.bf16.msra.mxu1 %v1917_v34  ;;  %1185 = vmatpush1.bf16.msra.mxu0 %v1942_v51  ;;  %v2308_v34 = vsub.s32 1, %v661_v31 }
  0x28   : > { %897 = vmatprep.subr.bf16.mxu1 %v1918_v35  ;;  %1186 = vmatprep.subr.bf16.mxu0 %v1947_v53  ;;  %v619_v35 = vld [vmem:[%s2536_s3] sm:$0x3] }
  0x29   : > { %v1948_v53 = vld [vmem:[%s2540_s7 + $0x20] ss:$8 sps:$4 sm:$0xff]  }
  0x2b   : > { %898 = vmatpush1.bf16.msra.mxu1 %v1920_v36  ;;  %1187 = vmatpush1.bf16.msra.mxu0 %v1945_v54  ;;  %v663_v36 = vrot.slane %v618_v33, %v2303_v32  ;;  %v1953_v54 = vld [vmem:[%s2540_s7 + $0x34] ss:$8 sps:$4 sm:$0xff]  }
  0x2c   : > { %899 = vmatprep.subr.bf16.mxu1 %v1921_v37  ;;  %1188 = vmatprep.subr.bf16.mxu0 %v1950_v52 }
  0x2f   : > { %900 = vmatpush1.bf16.msra.mxu1 %v1923_v38  ;;  %v667_v38 = vrot.slane %v618_v33, %v2308_v34  ;;  %1189 = vmatpush1.bf16.msra.mxu0 %v1948_v53 }
  0x30   : > { %901 = vmatprep.subr.bf16.mxu1 %v1924_v39  ;;  %1190 = vmatprep.subr.bf16.mxu0 %v1953_v54 }
  0x33   : > { %902 = vmatpush1.bf16.msra.mxu1 %v1926_v40 }
  0x34   : > { %903 = vmatprep.subr.bf16.mxu1 %v1927_v41  ;;  %v676_v41 = vrot.slane %v619_v35, %v2303_v32 }
  0x37   : > { %904 = vmatpush1.bf16.msra.mxu1 %v1929_v42 }
  0x38   : > { %905 = vmatprep.subr.bf16.mxu1 %v1930_v43  ;;  %v680_v43 = vrot.slane %v619_v35, %v2308_v34 }
  0x3b   : > { %906 = vmatpush1.bf16.msra.mxu1 %v1932_v44 }
  0x3c   : > { %907 = vmatprep.subr.bf16.mxu1 %v1933_v45 }
  0x3f   : > { %908 = vmatpush1.bf16.msra.mxu1 %v1935_v46 }
  0x40   : > { %909 = vmatprep.subr.bf16.mxu1 %v1936_v47 }
  0x43   : > { %910 = vmatpush1.bf16.msra.mxu1 %v1938_v48 }
  0x44   : > { %911 = vmatprep.subr.bf16.mxu1 %v1939_v49 }
  0x47   : > { %912 = vmatpush1.bf16.msra.mxu1 %v1941_v50 }
  0xf9   : > { %v611_v55 = vpop.f32.mrb[0].mxu0 }
  0xfa   : > { %v620_v56 = vrot.slane %v611_v55, 4  ;;  %v613_v57 = vpop.f32.mrb[1].mxu0 }
  0xfb   : > { %v626_v58 = vrot.slane %v613_v57, 4  ;;  %v615_v59 = vpop.f32.mrb[2].mxu0 }
  0xfc   : > { %v621_v60 = vadd.f32 %v620_v56, %v611_v55  ;;  %v616_v61 = vpop.f32.mrb[3].mxu0  ;;  %v1956_v56 = vld [vmem:[%s2540_s7 + $0x44] ss:$8 sps:$4 sm:$0xff]   ;;  %v1957_v59 = vld [vmem:[%s2540_s7 + $0x50] ss:$8 sps:$4 sm:$0xff]  }
  0xfd   : > { %v627_v62 = vadd.f32 %v626_v58, %v613_v57  ;;  %v1959_v58 = vld [vmem:[%s2540_s7 + $0x54] ss:$8 sps:$4 sm:$0xff]   ;;  %v1960_v61 = vld [vmem:[%s2540_s7 + $0x60] ss:$8 sps:$4 sm:$0xff]  }
  0xfe   : > { %v622_v63 = vrot.slane %v621_v60, 2 }
  0xff   : > { %v628_v0 = vrot.slane %v627_v62, 2 }
 0x100   : > { %v623_v1 = vadd.f32 %v622_v63, %v621_v60  ;;  %v1962_v60 = vld [vmem:[%s2540_s7 + $0x64] ss:$8 sps:$4 sm:$0xff]   ;;  %v1963_v63 = vld [vmem:[%s2540_s7 + $0x70] ss:$8 sps:$4 sm:$0xff]  }
 0x101   : > { %v629_v3 = vadd.f32 %v628_v0, %v627_v62  ;;  %v1965_v62 = vld [vmem:[%s2540_s7 + $0x74] ss:$8 sps:$4 sm:$0xff]   ;;  %v1968_v0 = vld [vmem:[%s2540_s7 + $0x84] ss:$8 sps:$4 sm:$0xff]  }
 0x102   : > { %v624_v4 = vrot.slane %v623_v1, 1 }
 0x103   : > { %v630_v5 = vrot.slane %v629_v3, 1 }
 0x104   : > { %v625_v6 = vadd.f32 %v624_v4, %v623_v1  ;;  %v1966_v1 = vld [vmem:[%s2540_s7 + $0x80] ss:$8 sps:$4 sm:$0xff]   ;;  %v1969_v4 = vld [vmem:[%s2540_s7 + $0x90] ss:$8 sps:$4 sm:$0xff]  }
 0x105   : > { %v631_v7 = vadd.f32 %v630_v5, %v629_v3  ;;  %v1971_v3 = vld [vmem:[%s2540_s7 + $0x94] ss:$8 sps:$4 sm:$0xff]   ;;  %v1974_v5 = vld [vmem:[%s2540_s7 + $0xa4] ss:$8 sps:$4 sm:$0xff]  }
 0x106   : > { %v633_v8 = vmul.f32 0.125, %v625_v6  ;;  %v1972_v6 = vld [vmem:[%s2540_s7 + $0xa0] ss:$8 sps:$4 sm:$0xff]  }
 0x107   : > { %v634_v9 = vmul.f32 0.125, %v631_v7  ;;  %v1977_v7 = vld [vmem:[%s2540_s7 + $0xb4] ss:$8 sps:$4 sm:$0xff]  }
 0x108   : > { %v635_v10 = vsub.f32 %v611_v55, %v633_v8  ;;  %v1951_v55 = vld [vmem:[%s2540_s7 + $0x30] ss:$8 sps:$4 sm:$0xff]  }
 0x109   : > { %v636_v11 = vsub.f32 %v613_v57, %v634_v9  ;;  %1191 = vmatpush1.bf16.msra.mxu0 %v1951_v55  ;;  %v1954_v57 = vld [vmem:[%s2540_s7 + $0x40] ss:$8 sps:$4 sm:$0xff]   ;;  %v1975_v8 = vld [vmem:[%s2540_s7 + $0xb0] ss:$8 sps:$4 sm:$0xff]   ;;  %v1980_v9 = vld [vmem:[%s2540_s7 + $0xc4] ss:$8 sps:$4 sm:$0xff]  }
 0x10a   : > { %v637_v12 = vmul.f32 %v635_v10, %v635_v10  ;;  %1192 = vmatprep.subr.bf16.mxu0 %v1956_v56 }
 0x10b   : > { %v638_v13 = vmul.f32 %v636_v11, %v636_v11 }
 0x10c   : > { %v639_v14 = vrot.slane %v637_v12, 4 }
 0x10d   : > { %v645_v15 = vrot.slane %v638_v13, 4  ;;  %1193 = vmatpush1.bf16.msra.mxu0 %v1954_v57  ;;  %v922_v57 = vld [vmem:[%s2538_s5] sm:$0x3] }
 0x10e   : > { %v640_v16 = vadd.f32 %v639_v14, %v637_v12  ;;  %1194 = vmatprep.subr.bf16.mxu0 %v1959_v58  ;;  %v1981_v12 = vld [vmem:[%s2540_s7 + $0xd0] ss:$8 sps:$4 sm:$0xff]   ;;  %v1986_v14 = vld [vmem:[%s2540_s7 + $0xe4] ss:$8 sps:$4 sm:$0xff]   ;;  %v923_v58 = vld [vmem:[%s2539_s6] sm:$0x3] }
 0x10f   : > { %v646_v17 = vadd.f32 %v645_v15, %v638_v13  ;;  %v1984_v13 = vld [vmem:[%s2540_s7 + $0xe0] ss:$8 sps:$4 sm:$0xff]   ;;  %v1989_v15 = vld [vmem:[%s2540_s7 + $0xf4] ss:$8 sps:$4 sm:$0xff]  }
 0x110   : > { %v641_v18 = vrot.slane %v640_v16, 2 }
 0x111   : > { %v647_v19 = vrot.slane %v646_v17, 2  ;;  %1195 = vmatpush1.bf16.msra.mxu0 %v1957_v59  ;;  %v966_v59 = vrot.slane %v922_v57, %v2303_v32 }
 0x112   : > { %v642_v20 = vadd.f32 %v641_v18, %v640_v16  ;;  %1196 = vmatprep.subr.bf16.mxu0 %v1962_v60  ;;  %v1987_v16 = vld [vmem:[%s2540_s7 + $0xf0] ss:$8 sps:$4 sm:$0xff]  }
 0x113   : > { %v648_v21 = vadd.f32 %v647_v19, %v646_v17 }
 0x114   : > { %v643_v22 = vrot.slane %v642_v20, 1 }
 0x115   : > { %v649_v23 = vrot.slane %v648_v21, 1  ;;  %1197 = vmatpush1.bf16.msra.mxu0 %v1960_v61  ;;  %v970_v61 = vrot.slane %v922_v57, %v2308_v34 }
 0x116   : > { %v644_v24 = vadd.f32 %v643_v22, %v642_v20  ;;  %1198 = vmatprep.subr.bf16.mxu0 %v1965_v62 }
 0x117   : > { %v650_v25 = vadd.f32 %v649_v23, %v648_v21 }
 0x118   : > { %v651_v26 = vmul.f32 0.125, %v644_v24 }
 0x119   : > { %v652_v27 = vmul.f32 0.125, %v650_v25  ;;  %1199 = vmatpush1.bf16.msra.mxu0 %v1963_v63 }
 0x11a   : > { %v653_v29 = vadd.f32 1e-05, %v651_v26  ;;  %1200 = vmatprep.subr.bf16.mxu0 %v1968_v0  ;;  %v979_v0 = vrot.slane %v923_v58, %v2303_v32 }
 0x11b   : > { %v654_v30 = vadd.f32 1e-05, %v652_v27 }
 0x11c   : > { %2030 = vrsqrt.f32 %v653_v29 }
 0x11d   : > { %2032 = vrsqrt.f32 %v654_v30  ;;  %1201 = vmatpush1.bf16.msra.mxu0 %v1966_v1 }
 0x11e   : > { %1202 = vmatprep.subr.bf16.mxu0 %v1971_v3  ;;  %v983_v3 = vrot.slane %v923_v58, %v2308_v34 }
 0x121   : > { %1203 = vmatpush1.bf16.msra.mxu0 %v1969_v4 }
 0x122   : > { %1204 = vmatprep.subr.bf16.mxu0 %v1974_v5 }
 0x125   : > { %1205 = vmatpush1.bf16.msra.mxu0 %v1972_v6 }
 0x126   : > { %v2031_v37 = vpop.eup %2030  ;;  %1206 = vmatprep.subr.bf16.mxu0 %v1977_v7 }
 0x127   : > { %v2033_v39 = vpop.eup %2032  ;;  %v657_v40 = vmul.f32 %v2031_v37, %v635_v10  ;;  %v1978_v10 = vld [vmem:[%s2540_s7 + $0xc0] ss:$8 sps:$4 sm:$0xff]  }
 0x128   : > { %v658_v42 = vmul.f32 %v2033_v39, %v636_v11  ;;  %v1983_v11 = vld [vmem:[%s2540_s7 + $0xd4] ss:$8 sps:$4 sm:$0xff]  }
 0x129   : > { %v670_v44 = vmul.f32 %v663_v36, %v657_v40  ;;  %1207 = vmatpush1.bf16.msra.mxu0 %v1975_v8 }
 0x12a   : > { %v671_v45 = vmul.f32 %v667_v38, %v658_v42  ;;  %1208 = vmatprep.subr.bf16.mxu0 %v1980_v9 }
 0x12b   : > { %v683_v46 = vadd.f32 %v676_v41, %v670_v44 }
 0x12c   : > { %v684_v47 = vadd.f32 %v680_v43, %v671_v45 }
 0x12d   : > { %v685_v48 = vmax.f32 %v683_v46, 0.0  ;;  %1209 = vmatpush1.bf16.msra.mxu0 %v1978_v10 }
 0x12e   : > { %v686_v49 = vmax.f32 %v684_v47, 0.0  ;;  %1210 = vmatprep.subr.bf16.mxu0 %v1983_v11 }
 0x12f   : > { %v687_v51 = vpack.c.bf16 %v685_v48, %v685_v48 }
 0x130   : > { %v688_v50 = vpack.c.bf16 %v686_v49, %v686_v49 }
 0x131   : > { %1211 = vmatpush1.bf16.msra.mxu0 %v1981_v12  ;;  %v1990_v12 = vld [vmem:[%s2541_s8 + $0x40] sm:$0xff]  }
 0x132   : > { %913 = vmatprep.mubr.bf16.mxu1 %v688_v50  ;;  %1212 = vmatprep.subr.bf16.mxu0 %v1986_v14  ;;  %v1992_v14 = vld [vmem:[%s2541_s8 + $0x48] sm:$0xff]  }
 0x133   : > { %914 = vmatmul.mubr.bf16.vlgmr.msra.gmra.mrb[0].mxu1 %v687_v51  ;;  %1839 = vmatprep.subr.bf16.mxu1 %v1990_v12  ;;  %v2011_v12 = vld [vmem:[%s2544_s11 + $0x14] ss:$8 sps:$4 sm:$0xff]  }
 0x135   : > { %1213 = vmatpush1.bf16.msra.mxu0 %v1984_v13  ;;  %v1991_v13 = vld [vmem:[%s2541_s8] sm:$0xff]  }
 0x136   : > { %1214 = vmatprep.subr.bf16.mxu0 %v1989_v15  ;;  %1840 = vmatpush3.bf16.msra.mxu1 %v1991_v13  ;;  %v1993_v15 = vld [vmem:[%s2541_s8 + $0x8] sm:$0xff]   ;;  %v2009_v13 = vld [vmem:[%s2544_s11 + $0x10] ss:$8 sps:$4 sm:$0xff]  }
 0x137   : > { %1841 = vmatprep.subr.bf16.mxu1 %v1992_v14  ;;  %v2014_v14 = vld [vmem:[%s2544_s11 + $0x24] ss:$8 sps:$4 sm:$0xff]  }
 0x139   : > { %1215 = vmatpush1.bf16.msra.mxu0 %v1987_v16  ;;  %v1995_v16 = vld [vmem:[%s2541_s8 + $0x10] sm:$0xff]  }
 0x13a   : > { %1842 = vmatpush3.bf16.msra.mxu1 %v1993_v15  ;;  %v2012_v15 = vld [vmem:[%s2544_s11 + $0x20] ss:$8 sps:$4 sm:$0xff]  }
 0x206   : > { %v915_v17 = vpop.f32.mrb[0].mxu1 }
 0x207   : > { %v924_v18 = vrot.slane %v915_v17, 4  ;;  %v917_v19 = vpop.f32.mrb[1].mxu1 }
 0x208   : > { %v930_v20 = vrot.slane %v917_v19, 4  ;;  %v919_v21 = vpop.f32.mrb[2].mxu1 }
 0x209   : > { %v925_v22 = vadd.f32 %v924_v18, %v915_v17  ;;  %v920_v23 = vpop.f32.mrb[3].mxu1  ;;  %v1997_v18 = vld [vmem:[%s2541_s8 + $0x18] sm:$0xff]   ;;  %v2000_v21 = vld [vmem:[%s2541_s8 + $0x68] sm:$0xff]  }
 0x20a   : > { %v931_v24 = vadd.f32 %v930_v20, %v917_v19  ;;  %v1999_v20 = vld [vmem:[%s2541_s8 + $0x20] sm:$0xff]   ;;  %v2002_v23 = vld [vmem:[%s2541_s8 + $0x70] sm:$0xff]  }
 0x20b   : > { %v926_v25 = vrot.slane %v925_v22, 2 }
 0x20c   : > { %v932_v26 = vrot.slane %v931_v24, 2 }
 0x20d   : > { %v927_v27 = vadd.f32 %v926_v25, %v925_v22  ;;  %v2001_v22 = vld [vmem:[%s2541_s8 + $0x28] sm:$0xff]   ;;  %v2004_v25 = vld [vmem:[%s2541_s8 + $0x78] sm:$0xff]  }
 0x20e   : > { %v933_v28 = vadd.f32 %v932_v26, %v931_v24  ;;  %v2003_v24 = vld [vmem:[%s2541_s8 + $0x30] sm:$0xff]   ;;  %v2005_v26 = vld [vmem:[%s2541_s8 + $0x38] sm:$0xff]  }
 0x20f   : > { %v928_v29 = vrot.slane %v927_v27, 1 }
 0x210   : > { %v934_v30 = vrot.slane %v933_v28, 1 }
 0x211   : > { %v929_v31 = vadd.f32 %v928_v29, %v927_v27 }
 0x212   : > { %v935_v33 = vadd.f32 %v934_v30, %v933_v28 }
 0x213   : > { %v936_v35 = vmul.f32 0.125, %v929_v31 }
 0x214   : > { %v937_v36 = vmul.f32 0.125, %v935_v33 }
 0x215   : > { %v938_v37 = vsub.f32 %v915_v17, %v936_v35  ;;  %v1996_v17 = vld [vmem:[%s2541_s8 + $0x58] sm:$0xff]  }
 0x216   : > { %v939_v38 = vsub.f32 %v917_v19, %v937_v36  ;;  %v1998_v19 = vld [vmem:[%s2541_s8 + $0x60] sm:$0xff]  }
 0x217   : > { %v940_v39 = vmul.f32 %v938_v37, %v938_v37 }
 0x218   : > { %v941_v40 = vmul.f32 %v939_v38, %v939_v38 }
 0x219   : > { %v942_v41 = vrot.slane %v940_v39, 4 }
 0x21a   : > { %v948_v42 = vrot.slane %v941_v40, 4 }
 0x21b   : > { %v943_v43 = vadd.f32 %v942_v41, %v940_v39 }
 0x21c   : > { %v949_v44 = vadd.f32 %v948_v42, %v941_v40 }
 0x21d   : > { %v944_v45 = vrot.slane %v943_v43, 2 }
 0x21e   : > { %v950_v46 = vrot.slane %v949_v44, 2 }
 0x21f   : > { %v945_v47 = vadd.f32 %v944_v45, %v943_v43 }
 0x220   : > { %v951_v48 = vadd.f32 %v950_v46, %v949_v44 }
 0x221   : > { %v946_v49 = vrot.slane %v945_v47, 1 }
 0x222   : > { %v952_v50 = vrot.slane %v951_v48, 1 }
 0x223   : > { %v947_v51 = vadd.f32 %v946_v49, %v945_v47 }
 0x224   : > { %v953_v52 = vadd.f32 %v952_v50, %v951_v48 }
 0x225   : > { %v954_v53 = vmul.f32 0.125, %v947_v51 }
 0x226   : > { %v955_v54 = vmul.f32 0.125, %v953_v52 }
 0x227   : > { %v956_v55 = vadd.f32 1e-05, %v954_v53 }
 0x228   : > { %v957_v56 = vadd.f32 1e-05, %v955_v54 }
 0x229   : > { %2034 = vrsqrt.f32 %v956_v55 }
 0x22a   : > { %2036 = vrsqrt.f32 %v957_v56 }
 0x233   : > { %v2035_v60 = vpop.eup %2034 }
 0x234   : > { %v2037_v62 = vpop.eup %2036  ;;  %v960_v63 = vmul.f32 %v2035_v60, %v938_v37 }
 0x235   : > { %v961_v1 = vmul.f32 %v2037_v62, %v939_v38 }
 0x236   : > { %v973_v4 = vmul.f32 %v966_v59, %v960_v63 }
 0x237   : > { %v974_v5 = vmul.f32 %v970_v61, %v961_v1 }
 0x238   : > { %v986_v6 = vadd.f32 %v979_v0, %v973_v4 }
 0x239   : > { %v987_v7 = vadd.f32 %v983_v3, %v974_v5 }
 0x23a   : > { %v988_v8 = vmax.f32 %v986_v6, 0.0 }
 0x23b   : > { %v989_v9 = vmax.f32 %v987_v7, 0.0 }
 0x23c   : > { %v990_v11 = vpack.c.bf16 %v988_v8, %v988_v8 }
 0x23d   : > { %v991_v10 = vpack.c.bf16 %v989_v9, %v989_v9 }
 0x23f   : > { %1216 = vmatprep.mubr.bf16.mxu0 %v991_v10  ;;  %v2008_v10 = vld [vmem:[%s2544_s11 + $0x4] ss:$8 sps:$4 sm:$0xff]  }
 0x240   : > { %1217 = vmatmul.mubr.bf16.vlgmr.msra.gmra.mrb[4].mxu0 %v990_v11  ;;  %v2006_v11 = vld [vmem:[%s2544_s11] ss:$8 sps:$4 sm:$0xff]   ;;  %1580 = vmatprep.subr.bf16.mxu0 %v2008_v10 }
 0x241   : > { %1612 = vmatprep.mubr.bf16.mxu0 %v2052_v2  ;;  %v1994_v2 = vld [vmem:[%s2541_s8 + $0x50] sm:$0xff]   ;;  %1581 = vmatpush1.bf16.msra.mxu0 %v2006_v11 }
 0x242   : > { %1843 = vmatprep.subr.bf16.mxu1 %v1994_v2  ;;  %1582 = vmatprep.subr.bf16.mxu0 %v2011_v12  ;;  %v2017_v2 = vld [vmem:[%s2544_s11 + $0x34] ss:$8 sps:$4 sm:$0xff]  }
 0x243   : > { %1844 = vmatpush3.bf16.msra.mxu1 %v1995_v16  ;;  %v2015_v16 = vld [vmem:[%s2544_s11 + $0x30] ss:$8 sps:$4 sm:$0xff]  }
 0x244   : > { %1845 = vmatprep.subr.bf16.mxu1 %v1996_v17  ;;  %v2020_v17 = vld [vmem:[%s2544_s11 + $0x44] ss:$8 sps:$4 sm:$0xff]  }
 0x245   : > { %1583 = vmatpush1.bf16.msra.mxu0 %v2009_v13 }
 0x246   : > { %1584 = vmatprep.subr.bf16.mxu0 %v2014_v14 }
 0x247   : > { %1846 = vmatpush3.bf16.msra.mxu1 %v1997_v18  ;;  %v2018_v18 = vld [vmem:[%s2544_s11 + $0x40] ss:$8 sps:$4 sm:$0xff]  }
 0x248   : > { %1847 = vmatprep.subr.bf16.mxu1 %v1998_v19  ;;  %v2023_v19 = vld [vmem:[%s2544_s11 + $0x54] ss:$8 sps:$4 sm:$0xff]  }
 0x249   : > { %1585 = vmatpush1.bf16.msra.mxu0 %v2012_v15 }
 0x24a   : > { %1586 = vmatprep.subr.bf16.mxu0 %v2017_v2 }
 0x24b   : > { %1848 = vmatpush3.bf16.msra.mxu1 %v1999_v20  ;;  %v2021_v20 = vld [vmem:[%s2544_s11 + $0x50] ss:$8 sps:$4 sm:$0xff]  }
 0x24c   : > { %1849 = vmatprep.subr.bf16.mxu1 %v2000_v21  ;;  %v2026_v21 = vld [vmem:[%s2544_s11 + $0x64] ss:$8 sps:$4 sm:$0xff]  }
 0x24d   : > { %1587 = vmatpush1.bf16.msra.mxu0 %v2015_v16 }
 0x24e   : > { %1588 = vmatprep.subr.bf16.mxu0 %v2020_v17 }
 0x24f   : > { %1850 = vmatpush3.bf16.msra.mxu1 %v2001_v22  ;;  %v2024_v22 = vld [vmem:[%s2544_s11 + $0x60] ss:$8 sps:$4 sm:$0xff]  }
 0x250   : > { %1851 = vmatprep.subr.bf16.mxu1 %v2002_v23  ;;  %v2029_v23 = vld [vmem:[%s2544_s11 + $0x74] ss:$8 sps:$4 sm:$0xff]  }
 0x251   : > { %1589 = vmatpush1.bf16.msra.mxu0 %v2018_v18 }
 0x252   : > { %1590 = vmatprep.subr.bf16.mxu0 %v2023_v19 }
 0x253   : > { %1852 = vmatpush3.bf16.msra.mxu1 %v2003_v24  ;;  %v2027_v24 = vld [vmem:[%s2544_s11 + $0x70] ss:$8 sps:$4 sm:$0xff]  }
 0x254   : > { %1853 = vmatprep.subr.bf16.mxu1 %v2004_v25 }
 0x255   : > { %1591 = vmatpush1.bf16.msra.mxu0 %v2021_v20 }
 0x256   : > { %1592 = vmatprep.subr.bf16.mxu0 %v2026_v21 }
 0x257   : > { %1854 = vmatpush3.bf16.msra.mxu1 %v2005_v26 }
 0x259   : > { %1593 = vmatpush1.bf16.msra.mxu0 %v2024_v22 }
 0x25a   : > { %1594 = vmatprep.subr.bf16.mxu0 %v2029_v23 }
 0x25d   : > { %1595 = vmatpush1.bf16.msra.mxu0 %v2027_v24 }
 0x313   : > { %v1218_v27 = vpop.f32.mrb[4].mxu0 }
 0x314   : > { %v1225_v28 = vrot.slane %v1218_v27, 4  ;;  %v1220_v29 = vpop.f32.mrb[5].mxu0 }
 0x315   : > { %v1231_v30 = vrot.slane %v1220_v29, 4  ;;  %v1222_v31 = vpop.f32.mrb[6].mxu0 }
 0x316   : > { %v1226_v33 = vadd.f32 %v1225_v28, %v1218_v27  ;;  %v1223_v35 = vpop.f32.mrb[7].mxu0 }
 0x317   : > { %v1232_v36 = vadd.f32 %v1231_v30, %v1220_v29 }
 0x318   : > { %v1227_v37 = vrot.slane %v1226_v33, 2 }
 0x319   : > { %v1233_v38 = vrot.slane %v1232_v36, 2 }
 0x31a   : > { %v1228_v39 = vadd.f32 %v1227_v37, %v1226_v33 }
 0x31b   : > { %v1234_v40 = vadd.f32 %v1233_v38, %v1232_v36 }
 0x31c   : > { %v1229_v41 = vrot.slane %v1228_v39, 1 }
 0x31d   : > { %v1235_v42 = vrot.slane %v1234_v40, 1 }
 0x31e   : > { %v1230_v43 = vadd.f32 %v1229_v41, %v1228_v39 }
 0x31f   : > { %v1236_v44 = vadd.f32 %v1235_v42, %v1234_v40 }
 0x320   : > { %v1237_v45 = vmul.f32 0.125, %v1230_v43 }
 0x321   : > { %v1238_v46 = vmul.f32 0.125, %v1236_v44 }
 0x322   : > { %v1239_v47 = vsub.f32 %v1218_v27, %v1237_v45 }
 0x323   : > { %v1240_v48 = vsub.f32 %v1220_v29, %v1238_v46 }
 0x324   : > { %v1241_v49 = vmul.f32 %v1239_v47, %v1239_v47 }
 0x325   : > { %v1242_v50 = vmul.f32 %v1240_v48, %v1240_v48 }
 0x326   : > { %v1243_v51 = vrot.slane %v1241_v49, 4 }
 0x327   : > { %v1249_v52 = vrot.slane %v1242_v50, 4 }
 0x328   : > { %v1244_v53 = vadd.f32 %v1243_v51, %v1241_v49 }
 0x329   : > { %v1250_v54 = vadd.f32 %v1249_v52, %v1242_v50  ;;  %v1817_v50 = vld [vmem:[%s2542_s9] ss:$0 sm:$0xff] }
 0x32a   : > { %v1245_v55 = vrot.slane %v1244_v53, 2  ;;  %v1818_v52 = vld [vmem:[%s2543_s10] ss:$0 sm:$0xff] }
 0x32b   : > { %v1251_v56 = vrot.slane %v1250_v54, 2 }
 0x32c   : > { %v1246_v57 = vadd.f32 %v1245_v55, %v1244_v53 }
 0x32d   : > { %v1252_v58 = vadd.f32 %v1251_v56, %v1250_v54 }
 0x32e   : > { %v1247_v59 = vrot.slane %v1246_v57, 1 }
 0x32f   : > { %v1253_v60 = vrot.slane %v1252_v58, 1 }
 0x330   : > { %v1248_v61 = vadd.f32 %v1247_v59, %v1246_v57  ;;  %v1488_v57 = vld [vmem:[%s2545_s12] sm:$0x3] }
 0x331   : > { %v1254_v62 = vadd.f32 %v1253_v60, %v1252_v58  ;;  %v1493_v58 = vrot.slane %v1488_v57, %v2303_v32  ;;  %v1497_v59 = vrot.slane %v1488_v57, %v2308_v34 }
 0x332   : > { %v1255_v63 = vmul.f32 0.125, %v1248_v61 }
 0x333   : > { %v1256_v0 = vmul.f32 0.125, %v1254_v62 }
 0x334   : > { %v1257_v1 = vadd.f32 1e-05, %v1255_v63 }
 0x335   : > { %v1258_v3 = vadd.f32 1e-05, %v1256_v0 }
 0x336   : > { %2038 = vrsqrt.f32 %v1257_v1 }
 0x337   : > { %2040 = vrsqrt.f32 %v1258_v3 }
 0x340   : > { %v2039_v4 = vpop.eup %2038 }
 0x341   : > { %v2041_v5 = vpop.eup %2040  ;;  %v1261_v6 = vmul.f32 %v2039_v4, %v1239_v47 }
 0x342   : > { %v1262_v7 = vmul.f32 %v2041_v5, %v1240_v48 }
 0x343   : > { %1263 = vst [vmem:[%s472_s26] sm:$0xff] %v1261_v6  ;;  %v1265_v9 = vpack.c.bf16 %v1261_v6, %v1261_v6 }
 0x344   : > { %v1266_v8 = vpack.c.bf16 %v1262_v7, %v1262_v7  ;;  %1264 = vst [vmem:[%s472_s26 + $0x8] sm:$0xff] %v1262_v7 }
 0x346   : > { %1427 = vmatprep.mubr.bf16.mxu1 %v1266_v8 }
 0x347   : > { %1428 = vmatmul.mubr.bf16.vlgmr.msra.gmra.mrb[4].mxu1 %v1265_v9 }
 0x41a   : > { %v1855_v25 = vpop.f32.mrb[4].mxu1 }
 0x41b   : > { %v1856_v26 = vpop.f32.mrb[5].mxu1 }
 0x41c   : > { %v1857_v27 = vadd.f32 %v1856_v26, %v1855_v25  ;;  %v1858_v28 = vpop.f32.mrb[6].mxu1 }
 0x41d   : > { %v1859_v29 = vpop.f32.mrb[7].mxu1 }
 0x41e   : > { %v1437_v30 = vrot.slane %v1857_v27, 4 }
 0x420   : > { %v1438_v31 = vadd.f32 %v1857_v27, %v1437_v30 }
 0x422   : > { %v1439_v33 = vrot.slane %v1438_v31, 2 }
 0x424   : > { %v1440_v35 = vadd.f32 %v1439_v33, %v1438_v31 }
 0x426   : > { %v1441_v36 = vrot.slane %v1440_v35, 1 }
 0x428   : > { %v1442_v37 = vadd.f32 %v1441_v36, %v1440_v35 }
 0x42a   : > { %v1443_v38 = vmul.f32 0.125, %v1442_v37 }
 0x42c   : > { %v1444_v39 = vsub.f32 %v1857_v27, %v1443_v38 }
 0x42e   : > { %v1445_v40 = vmul.f32 %v1444_v39, %v1444_v39 }
 0x430   : > { %v1446_v41 = vrot.slane %v1445_v40, 4 }
 0x432   : > { %v1447_v42 = vadd.f32 %v1446_v41, %v1445_v40 }
 0x434   : > { %v1448_v43 = vrot.slane %v1447_v42, 2 }
 0x436   : > { %v1449_v44 = vadd.f32 %v1448_v43, %v1447_v42 }
 0x438   : > { %v1450_v45 = vrot.slane %v1449_v44, 1 }
 0x43a   : > { %v1451_v46 = vadd.f32 %v1450_v45, %v1449_v44 }
 0x43c   : > { %v1452_v47 = vmul.f32 0.125, %v1451_v46 }
 0x43e   : > { %v1453_v48 = vadd.f32 1e-05, %v1452_v47 }
 0x440   : > { %2042 = vrsqrt.f32 %v1453_v48 }
 0x44a   : > { %v2043_v49 = vpop.eup %2042 }
 0x44b   : > { %v1455_v51 = vmul.f32 %v2043_v49, %v1444_v39 }
 0x44d   : > { %v1462_v53 = vmul.f32 %v1817_v50, %v1455_v51 }
 0x44f   : > { %v1469_v54 = vadd.f32 %v1818_v52, %v1462_v53 }
 0x451   : > { %v1470_v55 = vmax.f32 %v1469_v54, 0.0 }
 0x453   : > { %v1471_v56 = vpack.c.bf16 %v1470_v55, %v1470_v55 }
 0x455   : > { %1613 = vmatmul.mubr.bf16.vlgmr.msra.gmra.mrb[8].mxu0 %v1471_v56 }
 0x528   : > { %v1614_v60 = vpop.f32.mrb[8].mxu0 }
 0x529   : > { %v1615_v61 = vadd.f32 %v1614_v60, %v1493_v58  ;;  %v1616_v62 = vpop.f32.mrb[9].mxu0 }
 0x52a   : > { %v1617_v63 = vadd.f32 %v1616_v62, %v1497_v59  ;;  %v1618_v0 = vpop.f32.mrb[10].mxu0 }
 0x52b   : > { %1621 = vst [vmem:[%s477_s28] sm:$0xff] %v1615_v61  ;;  %v1619_v1 = vpop.f32.mrb[11].mxu0 }
 0x52c   : > { %1622 = vst [vmem:[%s477_s28 + $0x8] sm:$0xff] %v1617_v63 }
 0x52d PF: > { %s25_s29 = sadd.s32 1, %s2050_s29  }
 0x52e   : > { %p22_p4 = scmp.ge.s32.totalorder %s25_s29, 4  }
 0x530   :  { %24 = sbr.rel (!%p22_p4) target bundleno = 1 (0x1), region = 114 }

</bundles_post_ra>
